<compile_context>
chip_gen: v7x
topology: tpu7x:2x2x1
jax: 0.10.0
libtpu: 0.0.40
codegen_flags: <defaults>
</compile_context>

<pallas_src>
import functools

import jax
import jax.numpy as jnp
from jax.experimental import pallas as pl
from jax.experimental.pallas import tpu as pltpu


# ------------------------- in-kernel building blocks ------------------------ #

def _ln(x, g, b, eps=1e-5):
    # f32 layernorm (VPU/EUP math stays f32 for v5e compatibility)
    mu = jnp.mean(x, axis=-1, keepdims=True)
    var = jnp.mean(jnp.square(x - mu), axis=-1, keepdims=True)
    return (x - mu) * jax.lax.rsqrt(var + eps) * g + b


def _mha(x_ln, wqkv, bqkv, wo, bo, *, H, Dh, num_vis, S):
    """Multi-head self-attention on a (S, D) slab.  wqkv is the fused (D, 3D)
    projection (bf16); heads are lane slices of the fused output.  The GIT
    seq2seq mask is generated in-kernel (f32 additive)."""
    D = H * Dh
    qkv = jnp.dot(x_ln.astype(jnp.bfloat16), wqkv,
                  preferred_element_type=jnp.float32) + bqkv        # (S, 3D) f32
    scale = 1.0 / float(Dh) ** 0.5

    if num_vis < S:
        qi = jax.lax.broadcasted_iota(jnp.int32, (S, S), 0)
        ki = jax.lax.broadcasted_iota(jnp.int32, (S, S), 1)
        allowed = jnp.where(qi < num_vis, ki < num_vis,
                            (ki < num_vis) | (ki <= qi))
        mask = jnp.where(allowed, 0.0, -1e9).astype(jnp.float32)
    else:
        mask = None   # encoder: all tokens attend to all tokens

    head_outs = []
    for h in range(H):
        qh = qkv[:, h * Dh:(h + 1) * Dh].astype(jnp.bfloat16)
        kh = qkv[:, D + h * Dh:D + (h + 1) * Dh].astype(jnp.bfloat16)
        vh = qkv[:, 2 * D + h * Dh:2 * D + (h + 1) * Dh].astype(jnp.bfloat16)
        s = jax.lax.dot_general(qh, kh, (((1,), (1,)), ((), ())),
                                preferred_element_type=jnp.float32) * scale
        if mask is not None:
            s = s + mask                                             # f32 mask add
        s = s - jnp.max(s, axis=-1, keepdims=True)
        p = jnp.exp(s)
        p = p * pl.reciprocal(jnp.sum(p, axis=-1, keepdims=True), approx=True)
        head_outs.append(jnp.dot(p.astype(jnp.bfloat16), vh,
                                 preferred_element_type=jnp.float32))
    attn = jnp.concatenate(head_outs, axis=-1)                        # (S, H*Dh)
    return jnp.dot(attn.astype(jnp.bfloat16), wo,
                   preferred_element_type=jnp.float32) + bo


def _mlp(x, w1, b1, w2, b2):
    h = jnp.dot(x.astype(jnp.bfloat16), w1,
                preferred_element_type=jnp.float32) + b1
    # TODO(synk): exact erf-GELU has no clean Mosaic lowering; tanh approx used.
    h = jax.nn.gelu(h, approximate=True)
    return jnp.dot(h.astype(jnp.bfloat16), w2,
                   preferred_element_type=jnp.float32) + b2


# ------------------------------ Pallas kernels ------------------------------ #

def _encoder_kernel(patch_ref, pw_ref, pb_ref, pos_ref,
                    ln1g_ref, ln1b_ref, wqkv_ref, bqkv_ref, wo_ref, bo_ref,
                    ln2g_ref, ln2b_ref, w1_ref, b1_ref, w2_ref, b2_ref,
                    o_ref, *, H, Dh, Nv):
    # one batch element per grid step: patch-embed (conv-as-matmul) + pos add
    # + one pre-LN ViT block, fully fused.
    x = jnp.dot(patch_ref[0].astype(jnp.bfloat16), pw_ref[...],
                preferred_element_type=jnp.float32) + pb_ref[...] + pos_ref[...]
    y = _ln(x, ln1g_ref[...], ln1b_ref[...])
    x = x + _mha(y, wqkv_ref[...], bqkv_ref[...], wo_ref[...], bo_ref[...],
                 H=H, Dh=Dh, num_vis=Nv, S=Nv)
    y = _ln(x, ln2g_ref[...], ln2b_ref[...])
    x = x + _mlp(y, w1_ref[...], b1_ref[...], w2_ref[...], b2_ref[...])
    o_ref[0] = x


def _decoder_kernel(vis_ref, tok_ref,
                    vpw_ref, vpb_ref, vplng_ref, vplnb_ref,
                    elng_ref, elnb_ref,
                    wqkv_ref, bqkv_ref, wo_ref, bo_ref,
                    ln1g_ref, ln1b_ref, w1_ref, b1_ref, w2_ref, b2_ref,
                    ln2g_ref, ln2b_ref,
                    o_ref, *, H, Dh, Nv, T):
    # one batch element per grid step: visual projection + LN, embedding LN,
    # visual/text concat, one post-LN GIT decoder block with in-kernel
    # seq2seq mask; emits only the text-position hidden states.
    S = Nv + T
    vis = jnp.dot(vis_ref[0].astype(jnp.bfloat16), vpw_ref[...],
                  preferred_element_type=jnp.float32) + vpb_ref[...]
    vis = _ln(vis, vplng_ref[...], vplnb_ref[...])
    tok = _ln(tok_ref[0], elng_ref[...], elnb_ref[...])
    x = jnp.concatenate([vis, tok], axis=0)                       # (S, D)
    a = _mha(x, wqkv_ref[...], bqkv_ref[...], wo_ref[...], bo_ref[...],
             H=H, Dh=Dh, num_vis=Nv, S=S)
    x = _ln(x + a, ln1g_ref[...], ln1b_ref[...])
    m = _mlp(x, w1_ref[...], b1_ref[...], w2_ref[...], b2_ref[...])
    x = _ln(x + m, ln2g_ref[...], ln2b_ref[...])
    o_ref[0] = x[Nv:, :]                                          # (T, D)


def _proj_ce_kernel(h_ref, w_ref, b_ref, tgt_ref, valid_ref, sum_ref, cnt_ref):
    # fused vocab projection + masked cross entropy; logits never leave VMEM.
    logits = jnp.dot(h_ref[...].astype(jnp.bfloat16), w_ref[...],
                     preferred_element_type=jnp.float32) + b_ref[...]
    m = jnp.max(logits, axis=-1, keepdims=True)
    lse = jnp.log(jnp.sum(jnp.exp(logits - m), axis=-1, keepdims=True)) + m
    cols = jax.lax.broadcasted_iota(jnp.int32, logits.shape, 1)
    tgt_logit = jnp.sum(jnp.where(cols == tgt_ref[...], logits, 0.0),
                        axis=-1, keepdims=True)
    nll = lse - tgt_logit
    v = valid_ref[...]
    sum_ref[...] = jnp.sum(nll * v, axis=0, keepdims=True)
    cnt_ref[...] = jnp.sum(v, axis=0, keepdims=True)


# ----------------------------- kernel wrappers ------------------------------ #

def _wspec(shape):
    # weight replicated across the batch grid (all weights here are 2D)
    return pl.BlockSpec(shape, lambda b: (0, 0))


def pallas_encoder(patches, p, cfg):
    B, Nv, Cpp = patches.shape
    D, H, Dh = cfg['D'], cfg['H'], cfg['Dh']
    weights = [p['patch_w'], p['patch_b'], p['vis_pos'],
               p['vit_ln1_g'], p['vit_ln1_b'],
               p['vit_wqkv'], p['vit_bqkv'], p['vit_wo'], p['vit_bo'],
               p['vit_ln2_g'], p['vit_ln2_b'],
               p['vit_mlp_w1'], p['vit_mlp_b1'], p['vit_mlp_w2'], p['vit_mlp_b2']]
    in_specs = [pl.BlockSpec((1, Nv, Cpp), lambda b: (b, 0, 0))] + \
               [_wspec(w.shape) for w in weights]
    return pl.pallas_call(
        functools.partial(_encoder_kernel, H=H, Dh=Dh, Nv=Nv),
        out_shape=jax.ShapeDtypeStruct((B, Nv, D), jnp.float32),
        grid=(B,),
        in_specs=in_specs,
        out_specs=pl.BlockSpec((1, Nv, D), lambda b: (b, 0, 0)),
        compiler_params=pltpu.CompilerParams(dimension_semantics=("parallel",)),
    )(patches, *weights)


def pallas_decoder(visual_features, tok_emb, p, cfg):
    B, Nv, D = visual_features.shape
    T = tok_emb.shape[1]
    H, Dh = cfg['H'], cfg['Dh']
    weights = [p['vis_proj_w'], p['vis_proj_b'], p['vis_proj_ln_g'], p['vis_proj_ln_b'],
               p['emb_ln_g'], p['emb_ln_b'],
               p['dec_wqkv'], p['dec_bqkv'], p['dec_wo'], p['dec_bo'],
               p['dec_ln1_g'], p['dec_ln1_b'],
               p['dec_mlp_w1'], p['dec_mlp_b1'], p['dec_mlp_w2'], p['dec_mlp_b2'],
               p['dec_ln2_g'], p['dec_ln2_b']]
    in_specs = [pl.BlockSpec((1, Nv, D), lambda b: (b, 0, 0)),
                pl.BlockSpec((1, T, D), lambda b: (b, 0, 0))] + \
               [_wspec(w.shape) for w in weights]
    return pl.pallas_call(
        functools.partial(_decoder_kernel, H=H, Dh=Dh, Nv=Nv, T=T),
        out_shape=jax.ShapeDtypeStruct((B, T, D), jnp.float32),
        grid=(B,),
        in_specs=in_specs,
        out_specs=pl.BlockSpec((1, T, D), lambda b: (b, 0, 0)),
        compiler_params=pltpu.CompilerParams(dimension_semantics=("parallel",)),
    )(visual_features, tok_emb, *weights)


def pallas_proj_ce(hidden2d, out_w, out_b, targets, valid):
    M = hidden2d.shape[0]
    s, c = pl.pallas_call(
        _proj_ce_kernel,
        out_shape=(jax.ShapeDtypeStruct((1, 1), jnp.float32),
                   jax.ShapeDtypeStruct((1, 1), jnp.float32)),
    )(hidden2d, out_w, out_b,
      targets.reshape(M, 1).astype(jnp.int32),
      valid.reshape(M, 1).astype(jnp.float32))
    return s[0, 0], c[0, 0]


# -------------------------------- glue (JAX) -------------------------------- #

def image_to_patches(img_nchw, p):
    # non-overlapping patches in (c, ph, pw) row-major order == Conv2d(stride=p)
    # with its (D, C, p, p) weight flattened to (C*p*p, D).
    B, C, H, W = img_nchw.shape
    x = img_nchw.reshape(B, C, H // p, p, W // p, p)
    x = x.transpose(0, 2, 4, 1, 3, 5)           # B, Hp, Wp, C, ph, pw
    return x.reshape(B, (H // p) * (W // p), C * p * p)


# -------------------------------- the model --------------------------------- #

class SAMGitCaptioningModelPallas:
    """JAX/Pallas equivalent of SAMGitCaptioningModel's training forward pass
    (forward -> forward_one -> forward_one_ce with cross-entropy loss)."""

    def __init__(self, params, cfg, sos_index=1, eos_index=2):
        self.p = params
        self.cfg = cfg
        self.padding_idx = cfg['padding_idx']
        self.sos_index = sos_index
        self.eos_index = eos_index
        self.training = True

    def forward(self, batch):
        cfg, p = self.cfg, self.p

        # --- visual: patch-embed + pre-LN ViT block (one fused kernel) ---
        patches = image_to_patches(batch['image'], cfg['patch'])   # (B, Nv, C*p*p)
        visual_features = pallas_encoder(patches, p, cfg)          # (B, Nv, D)

        # --- textual: embeddings (gather in JAX) + fused GIT decoder block ---
        caption_tokens = batch['caption_tokens']
        B, T = caption_tokens.shape
        tok = jnp.take(p['word_emb'], caption_tokens, axis=0) + p['pos_emb'][None, :T, :]
        txt_hidden = pallas_decoder(visual_features, tok, p, cfg)  # (B, T, D)

        # --- masked cross-entropy (fused with the vocab projection) ---
        need_predict = batch['need_predict']
        target = jnp.where(need_predict == 0, self.padding_idx, caption_tokens)
        feat_hidden = txt_hidden[:, :-1, :].reshape(B * (T - 1), cfg['D'])
        target = target[:, 1:].reshape(-1)
        need_predict = need_predict[:, 1:].reshape(-1)
        # PyTorch: select need_predict==1, then CE(ignore_index=padding_idx);
        # equivalent masked-mean below (zero-valid batch -> loss 0, not NaN).
        valid = (need_predict == 1) & (target != self.padding_idx)
        loss_sum, loss_cnt = pallas_proj_ce(feat_hidden, p['out_w'], p['out_b'],
                                            target, valid)
        loss = loss_sum / jnp.maximum(loss_cnt, 1.0)
        return {'vl_l_loss': loss}


# -------------------------------- param init -------------------------------- #

def init_params(key, cfg):
    D, V, Nv, T = cfg['D'], cfg['vocab'], cfg['Nv'], cfg['T']
    C, patch = cfg['C'], cfg['patch']
    Cpp = C * patch * patch
    keys = iter(jax.random.split(key, 64))

    def nrm(shape):
        return jax.random.normal(next(keys), shape, jnp.float32) * 0.02

    def nrmb(shape):                      # bf16 matmul weights (MXU fast path)
        return nrm(shape).astype(jnp.bfloat16)

    zeros = lambda s: jnp.zeros(s, jnp.float32)
    ones = lambda s: jnp.ones(s, jnp.float32)

    def attn_params(prefix):
        return {f'{prefix}_wqkv': nrmb((D, 3 * D)),   # fused Q|K|V projection
                f'{prefix}_bqkv': zeros((1, 3 * D)),
                f'{prefix}_wo': nrmb((D, D)),
                f'{prefix}_bo': zeros((1, D))}

    params = {
        'patch_w': nrmb((Cpp, D)), 'patch_b': zeros((1, D)),
        'vis_pos': nrm((Nv, D)),
        'vit_ln1_g': ones((1, D)), 'vit_ln1_b': zeros((1, D)),
        'vit_ln2_g': ones((1, D)), 'vit_ln2_b': zeros((1, D)),
        'vit_mlp_w1': nrmb((D, 4 * D)), 'vit_mlp_b1': zeros((1, 4 * D)),
        'vit_mlp_w2': nrmb((4 * D, D)), 'vit_mlp_b2': zeros((1, D)),
        'vis_proj_w': nrmb((D, D)), 'vis_proj_b': zeros((1, D)),
        'vis_proj_ln_g': ones((1, D)), 'vis_proj_ln_b': zeros((1, D)),
        'word_emb': nrm((V, D)),
        'pos_emb': nrm((T, D)),
        'emb_ln_g': ones((1, D)), 'emb_ln_b': zeros((1, D)),
        'dec_ln1_g': ones((1, D)), 'dec_ln1_b': zeros((1, D)),
        'dec_mlp_w1': nrmb((D, 4 * D)), 'dec_mlp_b1': zeros((1, 4 * D)),
        'dec_mlp_w2': nrmb((4 * D, D)), 'dec_mlp_b2': zeros((1, D)),
        'dec_ln2_g': ones((1, D)), 'dec_ln2_b': zeros((1, D)),
        'out_w': nrmb((D, V)), 'out_b': zeros((1, V)),
    }
    params.update(attn_params('vit'))
    params.update(attn_params('dec'))
    return params


# ----------------------------------- main ------------------------------------ #

if __name__ == "__main__":
    # lane-dense config: D = H*Dh = 128, vocab = 128, MLP hidden = 512;
    # Nv = (16/4)^2 = 16 keeps the visual/text concat sublane-aligned.
    cfg = dict(B=2, C=3, HW=16, patch=4, D=128, H=2, Dh=64,
               vocab=128, T=8, padding_idx=0)
    cfg['Nv'] = (cfg['HW'] // cfg['patch']) ** 2

    key = jax.random.PRNGKey(0)
    pkey, ikey = jax.random.split(key)
    params = init_params(pkey, cfg)

    image = jax.random.normal(ikey, (cfg['B'], cfg['C'], cfg['HW'], cfg['HW']),
                              jnp.float32)
    caption_tokens = jnp.array([[1, 5, 9, 13, 2, 0, 0, 0],
                                [1, 7, 11, 15, 19, 23, 2, 0]], jnp.int32)
    need_predict = jnp.array([[0, 1, 1, 1, 1, 0, 0, 0],
                              [0, 1, 1, 1, 1, 1, 1, 0]], jnp.int32)
    batch = {'image': image,
             'caption_tokens': caption_tokens,
             'need_predict': need_predict}

    model = SAMGitCaptioningModelPallas(params, cfg)
    out = model.forward(batch)
    loss = jax.block_until_ready(out['vl_l_loss'])
    assert bool(jnp.isfinite(loss))
    print("KERNEL_OK")
</pallas_src>

<mosaic_0001>
module attributes {stable_mosaic.version = 11 : i64} {
  func.func @_encoder_kernel(%arg0: i32, %arg1: memref<1x16x48xf32, #tpu.memory_space<vmem>>, %arg2: memref<48x128xbf16, #tpu.memory_space<vmem>>, %arg3: memref<1x128xf32, #tpu.memory_space<vmem>>, %arg4: memref<16x128xf32, #tpu.memory_space<vmem>>, %arg5: memref<1x128xf32, #tpu.memory_space<vmem>>, %arg6: memref<1x128xf32, #tpu.memory_space<vmem>>, %arg7: memref<128x384xbf16, #tpu.memory_space<vmem>>, %arg8: memref<1x384xf32, #tpu.memory_space<vmem>>, %arg9: memref<128x128xbf16, #tpu.memory_space<vmem>>, %arg10: memref<1x128xf32, #tpu.memory_space<vmem>>, %arg11: memref<1x128xf32, #tpu.memory_space<vmem>>, %arg12: memref<1x128xf32, #tpu.memory_space<vmem>>, %arg13: memref<128x512xbf16, #tpu.memory_space<vmem>>, %arg14: memref<1x512xf32, #tpu.memory_space<vmem>>, %arg15: memref<512x128xbf16, #tpu.memory_space<vmem>>, %arg16: memref<1x128xf32, #tpu.memory_space<vmem>>, %arg17: memref<1x16x128xf32, #tpu.memory_space<vmem>>) attributes {dimension_semantics = [#tpu.dimension_semantics<parallel>], iteration_bounds = array<i64: 2>, scalar_prefetch = 0 : i64, scratch_operands = 0 : i64, tpu.core_type = #tpu.core_type<tc>, window_params = [{transform_indices = @transform_0, window_bounds = array<i64: 1, 16, 48>}, {pipeline_mode = #tpu.pipeline_mode<synchronous>, transform_indices = @transform_1, window_bounds = array<i64: 48, 128>}, {pipeline_mode = #tpu.pipeline_mode<synchronous>, transform_indices = @transform_2, window_bounds = array<i64: 1, 128>}, {pipeline_mode = #tpu.pipeline_mode<synchronous>, transform_indices = @transform_3, window_bounds = array<i64: 16, 128>}, {pipeline_mode = #tpu.pipeline_mode<synchronous>, transform_indices = @transform_4, window_bounds = array<i64: 1, 128>}, {pipeline_mode = #tpu.pipeline_mode<synchronous>, transform_indices = @transform_5, window_bounds = array<i64: 1, 128>}, {pipeline_mode = #tpu.pipeline_mode<synchronous>, transform_indices = @transform_6, window_bounds = array<i64: 128, 384>}, {pipeline_mode = #tpu.pipeline_mode<synchronous>, transform_indices = @transform_7, window_bounds = array<i64: 1, 384>}, {pipeline_mode = #tpu.pipeline_mode<synchronous>, transform_indices = @transform_8, window_bounds = array<i64: 128, 128>}, {pipeline_mode = #tpu.pipeline_mode<synchronous>, transform_indices = @transform_9, window_bounds = array<i64: 1, 128>}, {pipeline_mode = #tpu.pipeline_mode<synchronous>, transform_indices = @transform_10, window_bounds = array<i64: 1, 128>}, {pipeline_mode = #tpu.pipeline_mode<synchronous>, transform_indices = @transform_11, window_bounds = array<i64: 1, 128>}, {pipeline_mode = #tpu.pipeline_mode<synchronous>, transform_indices = @transform_12, window_bounds = array<i64: 128, 512>}, {pipeline_mode = #tpu.pipeline_mode<synchronous>, transform_indices = @transform_13, window_bounds = array<i64: 1, 512>}, {pipeline_mode = #tpu.pipeline_mode<synchronous>, transform_indices = @transform_14, window_bounds = array<i64: 512, 128>}, {pipeline_mode = #tpu.pipeline_mode<synchronous>, transform_indices = @transform_15, window_bounds = array<i64: 1, 128>}, {transform_indices = @transform_16, window_bounds = array<i64: 1, 16, 128>}]} {
    %c0 = arith.constant 0 : index
    %c0_0 = arith.constant 0 : index
    %c0_1 = arith.constant 0 : index
    %0 = vector.load %arg1[%c0, %c0_0, %c0_1] : memref<1x16x48xf32, #tpu.memory_space<vmem>>, vector<1x16x48xf32>
    %1 = vector.shape_cast %0 : vector<1x16x48xf32> to vector<16x48xf32>
    %2 = arith.truncf %1 : vector<16x48xf32> to vector<16x48xbf16>
    %c0_2 = arith.constant 0 : index
    %c0_3 = arith.constant 0 : index
    %3 = vector.load %arg2[%c0_2, %c0_3] : memref<48x128xbf16, #tpu.memory_space<vmem>>, vector<48x128xbf16>
    %cst = arith.constant dense<0.000000e+00> : vector<16x128xf32>
    %4 = tpu.matmul %2, %3, %cst {dimension_numbers = #tpu.dot_dimension_numbers<[1], [0], [0], [1], [0, 0, 1, 1], [], []>} : vector<16x48xbf16>, vector<48x128xbf16>, vector<16x128xf32> -> vector<16x128xf32>
    %c0_4 = arith.constant 0 : index
    %c0_5 = arith.constant 0 : index
    %5 = vector.load %arg3[%c0_4, %c0_5] : memref<1x128xf32, #tpu.memory_space<vmem>>, vector<1x128xf32>
    %6 = vector.broadcast %5 : vector<1x128xf32> to vector<16x128xf32>
    %7 = arith.addf %4, %6 : vector<16x128xf32>
    %c0_6 = arith.constant 0 : index
    %c0_7 = arith.constant 0 : index
    %8 = vector.load %arg4[%c0_6, %c0_7] : memref<16x128xf32, #tpu.memory_space<vmem>>, vector<16x128xf32>
    %9 = arith.addf %7, %8 : vector<16x128xf32>
    %c0_8 = arith.constant 0 : index
    %c0_9 = arith.constant 0 : index
    %10 = vector.load %arg5[%c0_8, %c0_9] : memref<1x128xf32, #tpu.memory_space<vmem>>, vector<1x128xf32>
    %c0_10 = arith.constant 0 : index
    %c0_11 = arith.constant 0 : index
    %11 = vector.load %arg6[%c0_10, %c0_11] : memref<1x128xf32, #tpu.memory_space<vmem>>, vector<1x128xf32>
    %cst_12 = arith.constant dense<0.000000e+00> : vector<16xf32>
    %12 = vector.multi_reduction <add>, %9, %cst_12 [1] : vector<16x128xf32> to vector<16xf32>
    %13 = vector.shape_cast %12 : vector<16xf32> to vector<16x1xf32>
    %cst_13 = arith.constant 1.280000e+02 : f32
    %14 = vector.broadcast %cst_13 : f32 to vector<16x1xf32>
    %15 = arith.divf %13, %14 : vector<16x1xf32>
    %16 = vector.broadcast %15 : vector<16x1xf32> to vector<16x128xf32>
    %17 = arith.subf %9, %16 : vector<16x128xf32>
    %18 = arith.mulf %17, %17 : vector<16x128xf32>
    %cst_14 = arith.constant dense<0.000000e+00> : vector<16xf32>
    %19 = vector.multi_reduction <add>, %18, %cst_14 [1] : vector<16x128xf32> to vector<16xf32>
    %20 = vector.shape_cast %19 : vector<16xf32> to vector<16x1xf32>
    %cst_15 = arith.constant 1.280000e+02 : f32
    %21 = vector.broadcast %cst_15 : f32 to vector<16x1xf32>
    %22 = arith.divf %20, %21 : vector<16x1xf32>
    %23 = vector.broadcast %15 : vector<16x1xf32> to vector<16x128xf32>
    %24 = arith.subf %9, %23 : vector<16x128xf32>
    %cst_16 = arith.constant 9.99999974E-6 : f32
    %25 = vector.broadcast %cst_16 : f32 to vector<16x1xf32>
    %26 = arith.addf %22, %25 : vector<16x1xf32>
    %27 = math.rsqrt %26 : vector<16x1xf32>
    %28 = vector.broadcast %27 : vector<16x1xf32> to vector<16x128xf32>
    %29 = arith.mulf %24, %28 : vector<16x128xf32>
    %30 = vector.broadcast %10 : vector<1x128xf32> to vector<16x128xf32>
    %31 = arith.mulf %29, %30 : vector<16x128xf32>
    %32 = vector.broadcast %11 : vector<1x128xf32> to vector<16x128xf32>
    %33 = arith.addf %31, %32 : vector<16x128xf32>
    %c0_17 = arith.constant 0 : index
    %c0_18 = arith.constant 0 : index
    %34 = vector.load %arg7[%c0_17, %c0_18] : memref<128x384xbf16, #tpu.memory_space<vmem>>, vector<128x384xbf16>
    %c0_19 = arith.constant 0 : index
    %c0_20 = arith.constant 0 : index
    %35 = vector.load %arg8[%c0_19, %c0_20] : memref<1x384xf32, #tpu.memory_space<vmem>>, vector<1x384xf32>
    %c0_21 = arith.constant 0 : index
    %c0_22 = arith.constant 0 : index
    %36 = vector.load %arg9[%c0_21, %c0_22] : memref<128x128xbf16, #tpu.memory_space<vmem>>, vector<128x128xbf16>
    %c0_23 = arith.constant 0 : index
    %c0_24 = arith.constant 0 : index
    %37 = vector.load %arg10[%c0_23, %c0_24] : memref<1x128xf32, #tpu.memory_space<vmem>>, vector<1x128xf32>
    %38 = arith.truncf %33 : vector<16x128xf32> to vector<16x128xbf16>
    %cst_25 = arith.constant dense<0.000000e+00> : vector<16x384xf32>
    %39 = tpu.matmul %38, %34, %cst_25 {dimension_numbers = #tpu.dot_dimension_numbers<[1], [0], [0], [1], [0, 0, 1, 1], [], []>} : vector<16x128xbf16>, vector<128x384xbf16>, vector<16x384xf32> -> vector<16x384xf32>
    %40 = vector.broadcast %35 : vector<1x384xf32> to vector<16x384xf32>
    %41 = arith.addf %39, %40 : vector<16x384xf32>
    %42 = vector.extract_strided_slice %41 {offsets = [0, 0], sizes = [16, 64], strides = [1, 1]} : vector<16x384xf32> to vector<16x64xf32>
    %43 = arith.truncf %42 : vector<16x64xf32> to vector<16x64xbf16>
    %44 = vector.extract_strided_slice %41 {offsets = [0, 128], sizes = [16, 64], strides = [1, 1]} : vector<16x384xf32> to vector<16x64xf32>
    %45 = arith.truncf %44 : vector<16x64xf32> to vector<16x64xbf16>
    %46 = vector.extract_strided_slice %41 {offsets = [0, 256], sizes = [16, 64], strides = [1, 1]} : vector<16x384xf32> to vector<16x64xf32>
    %47 = arith.truncf %46 : vector<16x64xf32> to vector<16x64xbf16>
    %cst_26 = arith.constant dense<0.000000e+00> : vector<16x16xf32>
    %48 = tpu.matmul %43, %45, %cst_26 {dimension_numbers = #tpu.dot_dimension_numbers<[1], [1], [0], [0], [0, 0, 1, 0], [], []>} : vector<16x64xbf16>, vector<16x64xbf16>, vector<16x16xf32> -> vector<16x16xf32>
    %cst_27 = arith.constant 1.250000e-01 : f32
    %49 = vector.broadcast %cst_27 : f32 to vector<16x16xf32>
    %50 = arith.mulf %48, %49 : vector<16x16xf32>
    %cst_28 = arith.constant dense<0xFF800000> : vector<16xf32>
    %51 = vector.multi_reduction <maximumf>, %50, %cst_28 [1] : vector<16x16xf32> to vector<16xf32>
    %52 = vector.shape_cast %51 : vector<16xf32> to vector<16x1xf32>
    %53 = vector.broadcast %52 : vector<16x1xf32> to vector<16x16xf32>
    %54 = arith.subf %50, %53 : vector<16x16xf32>
    %55 = math.exp %54 : vector<16x16xf32>
    %cst_29 = arith.constant dense<0.000000e+00> : vector<16xf32>
    %56 = vector.multi_reduction <add>, %55, %cst_29 [1] : vector<16x16xf32> to vector<16xf32>
    %57 = vector.shape_cast %56 : vector<16xf32> to vector<16x1xf32>
    %58 = tpu.reciprocal %57 {approx = true} : vector<16x1xf32> -> vector<16x1xf32>
    %59 = vector.broadcast %58 : vector<16x1xf32> to vector<16x16xf32>
    %60 = arith.mulf %55, %59 : vector<16x16xf32>
    %61 = arith.truncf %60 : vector<16x16xf32> to vector<16x16xbf16>
    %cst_30 = arith.constant dense<0.000000e+00> : vector<16x64xf32>
    %62 = tpu.matmul %61, %47, %cst_30 {dimension_numbers = #tpu.dot_dimension_numbers<[1], [0], [0], [1], [0, 0, 1, 1], [], []>} : vector<16x16xbf16>, vector<16x64xbf16>, vector<16x64xf32> -> vector<16x64xf32>
    %63 = vector.extract_strided_slice %41 {offsets = [0, 64], sizes = [16, 64], strides = [1, 1]} : vector<16x384xf32> to vector<16x64xf32>
    %64 = arith.truncf %63 : vector<16x64xf32> to vector<16x64xbf16>
    %65 = vector.extract_strided_slice %41 {offsets = [0, 192], sizes = [16, 64], strides = [1, 1]} : vector<16x384xf32> to vector<16x64xf32>
    %66 = arith.truncf %65 : vector<16x64xf32> to vector<16x64xbf16>
    %67 = vector.extract_strided_slice %41 {offsets = [0, 320], sizes = [16, 64], strides = [1, 1]} : vector<16x384xf32> to vector<16x64xf32>
    %68 = arith.truncf %67 : vector<16x64xf32> to vector<16x64xbf16>
    %cst_31 = arith.constant dense<0.000000e+00> : vector<16x16xf32>
    %69 = tpu.matmul %64, %66, %cst_31 {dimension_numbers = #tpu.dot_dimension_numbers<[1], [1], [0], [0], [0, 0, 1, 0], [], []>} : vector<16x64xbf16>, vector<16x64xbf16>, vector<16x16xf32> -> vector<16x16xf32>
    %cst_32 = arith.constant 1.250000e-01 : f32
    %70 = vector.broadcast %cst_32 : f32 to vector<16x16xf32>
    %71 = arith.mulf %69, %70 : vector<16x16xf32>
    %cst_33 = arith.constant dense<0xFF800000> : vector<16xf32>
    %72 = vector.multi_reduction <maximumf>, %71, %cst_33 [1] : vector<16x16xf32> to vector<16xf32>
    %73 = vector.shape_cast %72 : vector<16xf32> to vector<16x1xf32>
    %74 = vector.broadcast %73 : vector<16x1xf32> to vector<16x16xf32>
    %75 = arith.subf %71, %74 : vector<16x16xf32>
    %76 = math.exp %75 : vector<16x16xf32>
    %cst_34 = arith.constant dense<0.000000e+00> : vector<16xf32>
    %77 = vector.multi_reduction <add>, %76, %cst_34 [1] : vector<16x16xf32> to vector<16xf32>
    %78 = vector.shape_cast %77 : vector<16xf32> to vector<16x1xf32>
    %79 = tpu.reciprocal %78 {approx = true} : vector<16x1xf32> -> vector<16x1xf32>
    %80 = vector.broadcast %79 : vector<16x1xf32> to vector<16x16xf32>
    %81 = arith.mulf %76, %80 : vector<16x16xf32>
    %82 = arith.truncf %81 : vector<16x16xf32> to vector<16x16xbf16>
    %cst_35 = arith.constant dense<0.000000e+00> : vector<16x64xf32>
    %83 = tpu.matmul %82, %68, %cst_35 {dimension_numbers = #tpu.dot_dimension_numbers<[1], [0], [0], [1], [0, 0, 1, 1], [], []>} : vector<16x16xbf16>, vector<16x64xbf16>, vector<16x64xf32> -> vector<16x64xf32>
    %84 = tpu.concatenate %62, %83 in 1 : vector<16x64xf32>, vector<16x64xf32> -> vector<16x128xf32>
    %85 = arith.truncf %84 : vector<16x128xf32> to vector<16x128xbf16>
    %cst_36 = arith.constant dense<0.000000e+00> : vector<16x128xf32>
    %86 = tpu.matmul %85, %36, %cst_36 {dimension_numbers = #tpu.dot_dimension_numbers<[1], [0], [0], [1], [0, 0, 1, 1], [], []>} : vector<16x128xbf16>, vector<128x128xbf16>, vector<16x128xf32> -> vector<16x128xf32>
    %87 = vector.broadcast %37 : vector<1x128xf32> to vector<16x128xf32>
    %88 = arith.addf %86, %87 : vector<16x128xf32>
    %89 = arith.addf %9, %88 : vector<16x128xf32>
    %c0_37 = arith.constant 0 : index
    %c0_38 = arith.constant 0 : index
    %90 = vector.load %arg11[%c0_37, %c0_38] : memref<1x128xf32, #tpu.memory_space<vmem>>, vector<1x128xf32>
    %c0_39 = arith.constant 0 : index
    %c0_40 = arith.constant 0 : index
    %91 = vector.load %arg12[%c0_39, %c0_40] : memref<1x128xf32, #tpu.memory_space<vmem>>, vector<1x128xf32>
    %cst_41 = arith.constant dense<0.000000e+00> : vector<16xf32>
    %92 = vector.multi_reduction <add>, %89, %cst_41 [1] : vector<16x128xf32> to vector<16xf32>
    %93 = vector.shape_cast %92 : vector<16xf32> to vector<16x1xf32>
    %cst_42 = arith.constant 1.280000e+02 : f32
    %94 = vector.broadcast %cst_42 : f32 to vector<16x1xf32>
    %95 = arith.divf %93, %94 : vector<16x1xf32>
    %96 = vector.broadcast %95 : vector<16x1xf32> to vector<16x128xf32>
    %97 = arith.subf %89, %96 : vector<16x128xf32>
    %98 = arith.mulf %97, %97 : vector<16x128xf32>
    %cst_43 = arith.constant dense<0.000000e+00> : vector<16xf32>
    %99 = vector.multi_reduction <add>, %98, %cst_43 [1] : vector<16x128xf32> to vector<16xf32>
    %100 = vector.shape_cast %99 : vector<16xf32> to vector<16x1xf32>
    %cst_44 = arith.constant 1.280000e+02 : f32
    %101 = vector.broadcast %cst_44 : f32 to vector<16x1xf32>
    %102 = arith.divf %100, %101 : vector<16x1xf32>
    %103 = vector.broadcast %95 : vector<16x1xf32> to vector<16x128xf32>
    %104 = arith.subf %89, %103 : vector<16x128xf32>
    %cst_45 = arith.constant 9.99999974E-6 : f32
    %105 = vector.broadcast %cst_45 : f32 to vector<16x1xf32>
    %106 = arith.addf %102, %105 : vector<16x1xf32>
    %107 = math.rsqrt %106 : vector<16x1xf32>
    %108 = vector.broadcast %107 : vector<16x1xf32> to vector<16x128xf32>
    %109 = arith.mulf %104, %108 : vector<16x128xf32>
    %110 = vector.broadcast %90 : vector<1x128xf32> to vector<16x128xf32>
    %111 = arith.mulf %109, %110 : vector<16x128xf32>
    %112 = vector.broadcast %91 : vector<1x128xf32> to vector<16x128xf32>
    %113 = arith.addf %111, %112 : vector<16x128xf32>
    %c0_46 = arith.constant 0 : index
    %c0_47 = arith.constant 0 : index
    %114 = vector.load %arg13[%c0_46, %c0_47] : memref<128x512xbf16, #tpu.memory_space<vmem>>, vector<128x512xbf16>
    %c0_48 = arith.constant 0 : index
    %c0_49 = arith.constant 0 : index
    %115 = vector.load %arg14[%c0_48, %c0_49] : memref<1x512xf32, #tpu.memory_space<vmem>>, vector<1x512xf32>
    %c0_50 = arith.constant 0 : index
    %c0_51 = arith.constant 0 : index
    %116 = vector.load %arg15[%c0_50, %c0_51] : memref<512x128xbf16, #tpu.memory_space<vmem>>, vector<512x128xbf16>
    %c0_52 = arith.constant 0 : index
    %c0_53 = arith.constant 0 : index
    %117 = vector.load %arg16[%c0_52, %c0_53] : memref<1x128xf32, #tpu.memory_space<vmem>>, vector<1x128xf32>
    %118 = arith.truncf %113 : vector<16x128xf32> to vector<16x128xbf16>
    %cst_54 = arith.constant dense<0.000000e+00> : vector<16x512xf32>
    %119 = tpu.matmul %118, %114, %cst_54 {dimension_numbers = #tpu.dot_dimension_numbers<[1], [0], [0], [1], [0, 0, 1, 1], [], []>} : vector<16x128xbf16>, vector<128x512xbf16>, vector<16x512xf32> -> vector<16x512xf32>
    %120 = vector.broadcast %115 : vector<1x512xf32> to vector<16x512xf32>
    %121 = arith.addf %119, %120 : vector<16x512xf32>
    %122 = arith.mulf %121, %121 : vector<16x512xf32>
    %123 = arith.mulf %121, %122 : vector<16x512xf32>
    %cst_55 = arith.constant 4.471500e-02 : f32
    %124 = vector.broadcast %cst_55 : f32 to vector<16x512xf32>
    %125 = arith.mulf %124, %123 : vector<16x512xf32>
    %126 = arith.addf %121, %125 : vector<16x512xf32>
    %cst_56 = arith.constant 0.797884583 : f32
    %127 = vector.broadcast %cst_56 : f32 to vector<16x512xf32>
    %128 = arith.mulf %127, %126 : vector<16x512xf32>
    %129 = math.tanh %128 : vector<16x512xf32>
    %cst_57 = arith.constant 1.000000e+00 : f32
    %130 = vector.broadcast %cst_57 : f32 to vector<16x512xf32>
    %131 = arith.addf %130, %129 : vector<16x512xf32>
    %cst_58 = arith.constant 5.000000e-01 : f32
    %132 = vector.broadcast %cst_58 : f32 to vector<16x512xf32>
    %133 = arith.mulf %132, %131 : vector<16x512xf32>
    %134 = arith.mulf %121, %133 : vector<16x512xf32>
    %135 = arith.truncf %134 : vector<16x512xf32> to vector<16x512xbf16>
    %cst_59 = arith.constant dense<0.000000e+00> : vector<16x128xf32>
    %136 = tpu.matmul %135, %116, %cst_59 {dimension_numbers = #tpu.dot_dimension_numbers<[1], [0], [0], [1], [0, 0, 1, 1], [], []>} : vector<16x512xbf16>, vector<512x128xbf16>, vector<16x128xf32> -> vector<16x128xf32>
    %137 = vector.broadcast %117 : vector<1x128xf32> to vector<16x128xf32>
    %138 = arith.addf %136, %137 : vector<16x128xf32>
    %139 = arith.addf %89, %138 : vector<16x128xf32>
    %c0_60 = arith.constant 0 : index
    %c0_61 = arith.constant 0 : index
    %c0_62 = arith.constant 0 : index
    %140 = vector.load %arg17[%c0_60, %c0_61, %c0_62] : memref<1x16x128xf32, #tpu.memory_space<vmem>>, vector<1x16x128xf32>
    %141 = vector.shape_cast %140 : vector<1x16x128xf32> to vector<16x128xf32>
    %142 = vector.shape_cast %139 : vector<16x128xf32> to vector<1x16x128xf32>
    tpu.vector_store %arg17[%c0_60, %c0_61, %c0_62], %142 {strides = array<i32>} : memref<1x16x128xf32, #tpu.memory_space<vmem>>, vector<1x16x128xf32>,
    return
  }
  func.func @transform_0(%arg0: i32) -> (i32, i32, i32) {
    %c0_i32 = arith.constant 0 : i32
    %c0_i32_0 = arith.constant 0 : i32
    %c0_i32_1 = arith.constant 0 : i32
    return %arg0, %c0_i32, %c0_i32_0 : i32, i32, i32
  }
  func.func @transform_1(%arg0: i32) -> (i32, i32) {
    %c0_i32 = arith.constant 0 : i32
    %c0_i32_0 = arith.constant 0 : i32
    %c0_i32_1 = arith.constant 0 : i32
    return %c0_i32, %c0_i32_0 : i32, i32
  }
  func.func @transform_2(%arg0: i32) -> (i32, i32) {
    %c0_i32 = arith.constant 0 : i32
    %c0_i32_0 = arith.constant 0 : i32
    %c0_i32_1 = arith.constant 0 : i32
    return %c0_i32, %c0_i32_0 : i32, i32
  }
  func.func @transform_3(%arg0: i32) -> (i32, i32) {
    %c0_i32 = arith.constant 0 : i32
    %c0_i32_0 = arith.constant 0 : i32
    %c0_i32_1 = arith.constant 0 : i32
    return %c0_i32, %c0_i32_0 : i32, i32
  }
  func.func @transform_4(%arg0: i32) -> (i32, i32) {
    %c0_i32 = arith.constant 0 : i32
    %c0_i32_0 = arith.constant 0 : i32
    %c0_i32_1 = arith.constant 0 : i32
    return %c0_i32, %c0_i32_0 : i32, i32
  }
  func.func @transform_5(%arg0: i32) -> (i32, i32) {
    %c0_i32 = arith.constant 0 : i32
    %c0_i32_0 = arith.constant 0 : i32
    %c0_i32_1 = arith.constant 0 : i32
    return %c0_i32, %c0_i32_0 : i32, i32
  }
  func.func @transform_6(%arg0: i32) -> (i32, i32) {
    %c0_i32 = arith.constant 0 : i32
    %c0_i32_0 = arith.constant 0 : i32
    %c0_i32_1 = arith.constant 0 : i32
    return %c0_i32, %c0_i32_0 : i32, i32
  }
  func.func @transform_7(%arg0: i32) -> (i32, i32) {
    %c0_i32 = arith.constant 0 : i32
    %c0_i32_0 = arith.constant 0 : i32
    %c0_i32_1 = arith.constant 0 : i32
    return %c0_i32, %c0_i32_0 : i32, i32
  }
  func.func @transform_8(%arg0: i32) -> (i32, i32) {
    %c0_i32 = arith.constant 0 : i32
    %c0_i32_0 = arith.constant 0 : i32
    %c0_i32_1 = arith.constant 0 : i32
    return %c0_i32, %c0_i32_0 : i32, i32
  }
  func.func @transform_9(%arg0: i32) -> (i32, i32) {
    %c0_i32 = arith.constant 0 : i32
    %c0_i32_0 = arith.constant 0 : i32
    %c0_i32_1 = arith.constant 0 : i32
    return %c0_i32, %c0_i32_0 : i32, i32
  }
  func.func @transform_10(%arg0: i32) -> (i32, i32) {
    %c0_i32 = arith.constant 0 : i32
    %c0_i32_0 = arith.constant 0 : i32
    %c0_i32_1 = arith.constant 0 : i32
    return %c0_i32, %c0_i32_0 : i32, i32
  }
  func.func @transform_11(%arg0: i32) -> (i32, i32) {
    %c0_i32 = arith.constant 0 : i32
    %c0_i32_0 = arith.constant 0 : i32
    %c0_i32_1 = arith.constant 0 : i32
    return %c0_i32, %c0_i32_0 : i32, i32
  }
  func.func @transform_12(%arg0: i32) -> (i32, i32) {
    %c0_i32 = arith.constant 0 : i32
    %c0_i32_0 = arith.constant 0 : i32
    %c0_i32_1 = arith.constant 0 : i32
    return %c0_i32, %c0_i32_0 : i32, i32
  }
  func.func @transform_13(%arg0: i32) -> (i32, i32) {
    %c0_i32 = arith.constant 0 : i32
    %c0_i32_0 = arith.constant 0 : i32
    %c0_i32_1 = arith.constant 0 : i32
    return %c0_i32, %c0_i32_0 : i32, i32
  }
  func.func @transform_14(%arg0: i32) -> (i32, i32) {
    %c0_i32 = arith.constant 0 : i32
    %c0_i32_0 = arith.constant 0 : i32
    %c0_i32_1 = arith.constant 0 : i32
    return %c0_i32, %c0_i32_0 : i32, i32
  }
  func.func @transform_15(%arg0: i32) -> (i32, i32) {
    %c0_i32 = arith.constant 0 : i32
    %c0_i32_0 = arith.constant 0 : i32
    %c0_i32_1 = arith.constant 0 : i32
    return %c0_i32, %c0_i32_0 : i32, i32
  }
  func.func @transform_16(%arg0: i32) -> (i32, i32, i32) {
    %c0_i32 = arith.constant 0 : i32
    %c0_i32_0 = arith.constant 0 : i32
    %c0_i32_1 = arith.constant 0 : i32
    return %arg0, %c0_i32, %c0_i32_0 : i32, i32, i32
  }
}

</mosaic_0001>

<bundles_post_ra>
// kernel: tpu_custom_call.1
= control target key start
LH: loop header
LB: loop body
LE: loop exit
PB: predicated region body
PF: predicated region fallthrough
CT: control target
= control target key end

     0   :  { %s3883_s0 = inlined_call_operand.hbm [shape: f32[2,16,48], index: 0, kind: input, shape index: {}]   ;;  %s3884_s1 = inlined_call_operand.hbm [shape: bf16[48,128], index: 1, kind: input, shape index: {}]   ;;  %s3885_s2 = inlined_call_operand.hbm [shape: f32[1,128], index: 2, kind: input, shape index: {}]   ;;  %s3886_s3 = inlined_call_operand.hbm [shape: f32[16,128], index: 3, kind: input, shape index: {}]   ;;  %s3887_s4 = inlined_call_operand.vmem [shape: f32[1,128], index: 4, kind: input, shape index: {}]   ;;  %s3888_s5 = inlined_call_operand.vmem [shape: f32[1,128], index: 5, kind: input, shape index: {}]   ;;  %s3889_s6 = inlined_call_operand.hbm [shape: bf16[128,384], index: 6, kind: input, shape index: {}]   ;;  %s3890_s7 = inlined_call_operand.vmem [shape: f32[1,384], index: 7, kind: input, shape index: {}]   ;;  %s3891_s8 = inlined_call_operand.hbm [shape: bf16[128,128], index: 8, kind: input, shape index: {}]   ;;  %s3892_s9 = inlined_call_operand.vmem [shape: f32[1,128], index: 9, kind: input, shape index: {}]   ;;  %s3893_s10 = inlined_call_operand.vmem [shape: f32[1,128], index: 10, kind: input, shape index: {}]   ;;  %s3894_s11 = inlined_call_operand.vmem [shape: f32[1,128], index: 11, kind: input, shape index: {}]   ;;  %s3895_s12 = inlined_call_operand.hbm [shape: bf16[128,512], index: 12, kind: input, shape index: {}]   ;;  %s3896_s13 = inlined_call_operand.vmem [shape: f32[1,512], index: 13, kind: input, shape index: {}]   ;;  %s3897_s14 = inlined_call_operand.hbm [shape: bf16[512,128], index: 14, kind: input, shape index: {}]   ;;  %s3898_s15 = inlined_call_operand.vmem [shape: f32[1,128], index: 15, kind: input, shape index: {}]   ;;  %s3899_s16 = inlined_call_operand.hbm [shape: f32[2,16,128], index: 16, kind: output, shape index: {}]  }
   0x1   :  { %3910 = sst [smem:[#allocation23_spill]] %s3883_s0 }
   0x2   :  { %3911 = sst [smem:[#allocation24_spill]] %s3884_s1 }
   0x3   :  { %3912 = sst [smem:[#allocation25_spill]] %s3890_s7 }
   0x4   :  { %3913 = sst [smem:[#allocation26_spill]] %s3892_s9 }
   0x5   :  { %3914 = sst [smem:[#allocation27_spill]] %s3893_s10 }
   0x6   :  { %3915 = sst [smem:[#allocation28_spill]] %s3894_s11 }
   0x7   :  { %3916 = sst [smem:[#allocation29_spill]] %s3896_s13 }
   0x8   :  { %3917 = sst [smem:[#allocation30_spill]] %s3898_s15 }
   0x9   :  { %3918 = sst [smem:[#allocation31_spill]] %s3899_s16 }
   0xa   :  { %21 = vsyncpa [#allocation3], 0 }
   0xb   :  { %23 = vsyncpa [#allocation3 + $0x1], 0 }
   0xc   :  { %24 = vsyncpa [#allocation6], 0 }
   0xd   :  { %25 = vsyncpa [#allocation9], 0 }
   0xe   :  { %26 = vsyncpa [#allocation12], 0 }
   0xf   :  { %27 = vsyncpa [#allocation15], 0 }
  0x10   :  { %28 = vsyncpa [#allocation4], 0 }
  0x11   :  { %30 = vsyncpa [#allocation4 + $0x1], 0  ;;  %s3325_s21 = smov 0   ;;  %s3327_s22 = smov 0  }
  0x12   :  { %s3329_s23 = smov 0   ;;  %s3331_s24 = smov 0  }
  0x13 LB: > { %s3217_s25 = smov [#allocation5]   ;;  %s3346_s27 = sadd.s32 4294967295, %s3215_s24   ;;  %s3215_s24 = sphi %s3331_s24, %s3955_s24   ;;  %s3211_s23 = sphi %s3329_s23, %s3954_s23   ;;  %s3207_s22 = sphi %s3327_s22, %s3953_s22   ;;  %s3203_s21 = sphi %s3325_s21, %s3952_s21  }
  0x14   : > { %s420_s26 = sshll.u32 %s3217_s25, 4  ;;  %p2320_p0 = scmp.ge.s32.totalorder %s3215_s24, 1  ;;  %s3351_s26 = int_to_ptr.vmem [resolvable:$true] %s420_s26 }
  0x15   : > { %p3904_p1 = scmp.eq.s32.totalorder %s3346_s27, 0  ;;  %p408_p2 = scmp.lt.s32.totalorder %s3215_s24, 3 }
  0x16   : > { %s3218_s29 = smov [#allocation8]   ;;  %s3219_s17 = smov [#allocation11]  }
  0x17   : > { %p3353_p3 = pnand %p2320_p0, %p408_p2  ;;  %s444_s30 = sshll.u32 %s3218_s29, 4  ;;  %s3366_s30 = int_to_ptr.vmem [resolvable:$true] %s444_s30 }
  0x18   : > { %s3368_s18 = sshll.u32 %s3219_s17, 4  ;;  %s3921_s1 = sld [smem:[#allocation24_spill]]  ;;  %s480_s18 = int_to_ptr.vmem [resolvable:$true] %s3368_s18 }
  0x19   : > { %s3919_s28 = scalar_select %p3353_p3, 1, 0 }
  0x1a   : > { %p2640_p5 = pneg %p3353_p3 }
  0x1c   : > { %p3362_p6 = pnand %p2640_p5, %p3904_p1 }
  0x1e   : > { %s2907_s25 = scalar_lea.hbm %s3921_s1, 384  ;;  %p3378_p8 = pneg %p3362_p6 }
  0x1f   : > { %p2908_p7 = scmp.ne.s32.totalorder %s3921_s1, %s2907_s25  ;;  %p2914_p11 = scmp.lt.u32.totalorder %s2907_s25, %s3921_s1 }
  0x21   : > { %p2910_p9 = pnand %p3378_p8, %p2908_p7 }
  0x23   : > { %p2911_p10 = pneg %p2910_p9 }
  0x25   : > { %p2916_p12 = pnand %p2914_p11, %p2911_p10 }
  0x27   : > { %2919 = shalt.err (!%p2916_p12)
}
  0x28   : > { %s2920_s15 = scalar_lea.vmem %s3351_s26, 384  ;;  %p2928_p5 = scmp.lt.s32.totalorder %s3351_s26, %s3351_s26 }
  0x29   : > { %p2921_p13 = scmp.ne.s32.totalorder %s3351_s26, %s2920_s15  ;;  %p2929_p4 = scmp.lt.s32.totalorder %s2920_s15, %s2920_s15 }
  0x2b   : > { %p2923_p0 = pnand %p2921_p13, %p3378_p8  ;;  %p2930_p7 = por %p2929_p4, %p2928_p5 }
  0x2d   : > { %p2924_p2 = pneg %p2923_p0 }
  0x2f   : > { %p2931_p9 = pnand %p2930_p7, %p2924_p2 }
  0x31   : > { %2934 = shalt.err (!%p2931_p9)
}
  0x32   : > { %s3902_s16 = smov 64   ;;  %s3908_s13 = smov 4  }
  0x33   : > { %2643 = dma.hbm_to_vmem [thread:$0]  (!%p3362_p6), %s3921_s1, 384, %s3351_s26, [#allocation6], %s3902_s16, %s3902_s16, %s3908_s13  }
  0x34   : > { %s2935_s15 = scalar_lea.hbm %s3886_s3, 256 }
  0x35   : > { %p2936_p4 = scmp.ne.s32.totalorder %s3886_s3, %s2935_s15  ;;  %p2942_p12 = scmp.lt.u32.totalorder %s2935_s15, %s3886_s3 }
  0x37   : > { %p2938_p10 = pnand %p2936_p4, %p3378_p8 }
  0x39   : > { %p2939_p11 = pneg %p2938_p10 }
  0x3b   : > { %p2944_p13 = pnand %p2942_p12, %p2939_p11 }
  0x3d   : > { %2947 = shalt.err (!%p2944_p13)
}
  0x3e   : > { %s2948_s26 = scalar_lea.vmem %s3366_s30, 256  ;;  %p2956_p7 = scmp.lt.s32.totalorder %s3366_s30, %s3366_s30 }
  0x3f   : > { %p2949_p0 = scmp.ne.s32.totalorder %s3366_s30, %s2948_s26  ;;  %p2957_p9 = scmp.lt.s32.totalorder %s2948_s26, %s2948_s26 }
  0x41   : > { %p2951_p2 = pnand %p2949_p0, %p3378_p8  ;;  %p2958_p4 = por %p2957_p9, %p2956_p7 }
  0x43   : > { %p2952_p5 = pneg %p2951_p2 }
  0x45   : > { %p2959_p10 = pnand %p2958_p4, %p2952_p5 }
  0x47   : > { %2962 = shalt.err (!%p2959_p10)
}
  0x48   : > { %s3906_s10 = smov 128   ;;  %s3907_s7 = smov 8  }
  0x49   : > { %2649 = dma.hbm_to_vmem [thread:$0]  (!%p3362_p6), %s3886_s3, 256, %s3366_s30, [#allocation9], %s3906_s10, %s3906_s10, %s3907_s7  }
  0x4a   : > { %s2963_s25 = scalar_lea.hbm %s3891_s8, 1024 }
  0x4b   : > { %p2964_p11 = scmp.ne.s32.totalorder %s3891_s8, %s2963_s25  ;;  %p2970_p0 = scmp.lt.u32.totalorder %s2963_s25, %s3891_s8 }
  0x4d   : > { %p2966_p12 = pnand %p2964_p11, %p3378_p8 }
  0x4f   : > { %p2967_p13 = pneg %p2966_p12 }
  0x51   : > { %p2972_p2 = pnand %p2970_p0, %p2967_p13 }
  0x53   : > { %2975 = shalt.err (!%p2972_p2)
}
  0x54   : > { %s2976_s9 = scalar_lea.vmem %s480_s18, 1024  ;;  %p2984_p4 = scmp.lt.s32.totalorder %s480_s18, %s480_s18 }
  0x55   : > { %p2977_p5 = scmp.ne.s32.totalorder %s480_s18, %s2976_s9  ;;  %p2985_p10 = scmp.lt.s32.totalorder %s2976_s9, %s2976_s9 }
  0x57   : > { %p2979_p7 = pnand %p2977_p5, %p3378_p8  ;;  %p2986_p1 = por %p2985_p10, %p2984_p4 }
  0x59   : > { %p2980_p9 = pneg %p2979_p7 }
  0x5b   : > { %p2987_p3 = pnand %p2986_p1, %p2980_p9 }
  0x5d   : > { %2990 = shalt.err (!%p2987_p3)
}
  0x5e   : > { %s3923_s30 = smov 64   ;;  %s3224_s19 = smov [#allocation7]  }
  0x5f   : > { %2655 = dma.hbm_to_vmem [thread:$0]  (!%p3362_p6), %s3891_s8, 1024, %s480_s18, [#allocation12], %s3923_s30, %s3923_s30, %s3908_s13  }
  0x60   : > { %s434_s20 = sshll.u32 %s3224_s19, 4  ;;  %s3225_s25 = smov [#allocation10]   ;;  %s435_s20 = int_to_ptr.vmem [resolvable:$true] %s434_s20 }
  0x61   : > { %s463_s17 = sshll.u32 %s3225_s25, 4  ;;  %s2991_s9 = scalar_lea.hbm %s3885_s2, 16  ;;  %s464_s17 = int_to_ptr.vmem [resolvable:$true] %s463_s17 }
  0x62   : > { %p2992_p1 = scmp.ne.s32.totalorder %s3885_s2, %s2991_s9  ;;  %p2998_p12 = scmp.lt.u32.totalorder %s2991_s9, %s3885_s2 }
  0x64   : > { %p2994_p3 = pnand %p2992_p1, %p3378_p8 }
  0x66   : > { %p2995_p11 = pneg %p2994_p3 }
  0x68   : > { %p3000_p13 = pnand %p2998_p12, %p2995_p11 }
  0x6a   : > { %3003 = shalt.err (!%p3000_p13)
}
  0x6b   : > { %s3004_s18 = scalar_lea.vmem %s435_s20, 16  ;;  %s3011_s11 = scalar_lea.vmem %s435_s20, 32 }
  0x6c   : > { %p3005_p0 = scmp.ne.s32.totalorder %s435_s20, %s3004_s18  ;;  %p3012_p7 = scmp.lt.s32.totalorder %s435_s20, %s435_s20 }
  0x6d   : > { %p3013_p9 = scmp.lt.s32.totalorder %s3011_s11, %s3004_s18 }
  0x6e   : > { %p3007_p2 = pnand %p3005_p0, %p3378_p8 }
  0x6f   : > { %p3014_p4 = por %p3013_p9, %p3012_p7 }
  0x70   : > { %p3008_p5 = pneg %p3007_p2 }
  0x72   : > { %p3015_p10 = pnand %p3014_p4, %p3008_p5 }
  0x74   : > { %3018 = shalt.err (!%p3015_p10)
}
  0x75   : > { %2646 = dma.hbm_to_vmem [thread:$0]  (!%p3362_p6), %s3885_s2, 16, %s435_s20, [#allocation6]  }
  0x76   : > { %s3019_s25 = scalar_lea.hbm %s3889_s6, 3072 }
  0x77   : > { %p3020_p1 = scmp.ne.s32.totalorder %s3889_s6, %s3019_s25  ;;  %p3026_p12 = scmp.lt.u32.totalorder %s3019_s25, %s3889_s6 }
  0x79   : > { %p3022_p3 = pnand %p3020_p1, %p3378_p8 }
  0x7b   : > { %p3023_p11 = pneg %p3022_p3 }
  0x7d   : > { %p3028_p13 = pnand %p3026_p12, %p3023_p11 }
  0x7f   : > { %3031 = shalt.err (!%p3028_p13)
}
  0x80   : > { %s3032_s18 = scalar_lea.vmem %s464_s17, 3072  ;;  %p3040_p7 = scmp.lt.s32.totalorder %s464_s17, %s464_s17 }
  0x81   : > { %p3033_p0 = scmp.ne.s32.totalorder %s464_s17, %s3032_s18  ;;  %p3041_p9 = scmp.lt.s32.totalorder %s3032_s18, %s3032_s18 }
  0x83   : > { %p3035_p2 = pnand %p3033_p0, %p3378_p8  ;;  %p3042_p4 = por %p3041_p9, %p3040_p7 }
  0x85   : > { %p3036_p5 = pneg %p3035_p2 }
  0x87   : > { %p3043_p10 = pnand %p3042_p4, %p3036_p5 }
  0x89   : > { %3046 = shalt.err (!%p3043_p10)
}
  0x8a   : > { %s3226_s20 = smov 192   ;;  %s3227_s11 = smov 12  }
  0x8b   : > { %2652 = dma.hbm_to_vmem [thread:$0]  (!%p3362_p6), %s3889_s6, 3072, %s464_s17, [#allocation9], %s3226_s20, %s3226_s20, %s3227_s11  }
  0x8c   : > { %s3228_s1 = smov [#allocation13]   ;;  %s3047_s26 = scalar_lea.hbm %s3895_s12, 4096 }
  0x8d   : > { %s501_s19 = sshll.u32 %s3228_s1, 4  ;;  %p3048_p1 = scmp.ne.s32.totalorder %s3895_s12, %s3047_s26  ;;  %s502_s19 = int_to_ptr.vmem [resolvable:$true] %s501_s19 }
  0x8e   : > { %p3054_p12 = scmp.lt.u32.totalorder %s3047_s26, %s3895_s12 }
  0x8f   : > { %p3050_p3 = pnand %p3048_p1, %p3378_p8 }
  0x91   : > { %p3051_p11 = pneg %p3050_p3 }
  0x93   : > { %p3056_p13 = pnand %p3054_p12, %p3051_p11 }
  0x95   : > { %3059 = shalt.err (!%p3056_p13)
}
  0x96   : > { %s3060_s17 = scalar_lea.vmem %s502_s19, 4096  ;;  %p3068_p7 = scmp.lt.s32.totalorder %s502_s19, %s502_s19 }
  0x97   : > { %p3061_p0 = scmp.ne.s32.totalorder %s502_s19, %s3060_s17  ;;  %p3069_p9 = scmp.lt.s32.totalorder %s3060_s17, %s3060_s17 }
  0x99   : > { %p3063_p2 = pnand %p3061_p0, %p3378_p8  ;;  %p3070_p4 = por %p3069_p9, %p3068_p7 }
  0x9b   : > { %p3064_p5 = pneg %p3063_p2 }
  0x9d   : > { %p3071_p10 = pnand %p3070_p4, %p3064_p5 }
  0x9f   : > { %3074 = shalt.err (!%p3071_p10)
}
  0xa0   : > { %s3229_s20 = smov 256   ;;  %s3230_s11 = smov 16  }
  0xa1   : > { %2658 = dma.hbm_to_vmem [thread:$0]  (!%p3362_p6), %s3895_s12, 4096, %s502_s19, [#allocation12], %s3229_s20, %s3229_s20, %s3230_s11  }
  0xa2   : > { %s3231_s7 = smov [#allocation14]   ;;  %s3075_s26 = scalar_lea.hbm %s3897_s14, 4096 }
  0xa3   : > { %s517_s1 = sshll.u32 %s3231_s7, 4  ;;  %p3076_p1 = scmp.ne.s32.totalorder %s3897_s14, %s3075_s26  ;;  %s518_s1 = int_to_ptr.vmem [resolvable:$true] %s517_s1 }
  0xa4   : > { %p3082_p12 = scmp.lt.u32.totalorder %s3075_s26, %s3897_s14 }
  0xa5   : > { %p3078_p3 = pnand %p3076_p1, %p3378_p8 }
  0xa7   : > { %p3079_p11 = pneg %p3078_p3 }
  0xa9   : > { %p3084_p13 = pnand %p3082_p12, %p3079_p11 }
  0xab   : > { %3087 = shalt.err (!%p3084_p13)
}
  0xac   : > { %s3088_s19 = scalar_lea.vmem %s518_s1, 4096  ;;  %p3096_p7 = scmp.lt.s32.totalorder %s518_s1, %s518_s1 }
  0xad   : > { %p3089_p0 = scmp.ne.s32.totalorder %s518_s1, %s3088_s19  ;;  %p3097_p9 = scmp.lt.s32.totalorder %s3088_s19, %s3088_s19 }
  0xaf   : > { %p3091_p2 = pnand %p3089_p0, %p3378_p8  ;;  %p3098_p4 = por %p3097_p9, %p3096_p7 }
  0xb1   : > { %p3092_p5 = pneg %p3091_p2 }
  0xb3   : > { %p3099_p10 = pnand %p3098_p4, %p3092_p5 }
  0xb5   : > { %3102 = shalt.err (!%p3099_p10)
}
  0xb6   : > { %s3924_s20 = smov 4   ;;  %s2319_s0 = sadd.s32 4294967294, %s3215_s24  }
  0xb7   : > { %2661 = dma.hbm_to_vmem [thread:$0]  (!%p3362_p6), %s3897_s14, 4096, %s518_s1, [#allocation15], %s3923_s30, %s3923_s30, %s3924_s20  }
  0xb8   : > { %s3527_s29 = sadd.s32 1, %s3215_s24   ;;  %s43_s10 = sadd.s32 1, %s3211_s23 }
  0xb9   : > { %s40_s7 = ssub.s32 %s3215_s24, %s3527_s29  ;;  %p50_p8 = scmp.ne.s32.totalorder %s3211_s23, %s3207_s22 }
  0xba   : > { %p41_p1 = scmp.eq.s32.totalorder %s40_s7, 0  ;;  %p51_p3 = scmp.eq.s32.totalorder %s3215_s24, 0 }
  0xbb   : > { %p56_p11 = scmp.ne.s32.totalorder %s3207_s22, %s3203_s21  ;;  %p395_p12 = scmp.eq.s32.totalorder %s3346_s27, 1 }
  0xbc   : > { %s3539_s25 = scalar_select %p41_p1, %s3211_s23, %s43_s10  }
  0xbd   : > { %p52_p13 = por %p51_p3, %p50_p8  ;;  %p3925_p0 = scmp.eq.s32.totalorder %s3346_s27, 0 }
  0xbe   : > { %p3547_p6 = por %p395_p12, %p50_p8  ;;  %p401_p5 = scmp.eq.s32.totalorder %s2319_s0, 1 }
  0xbf   : > { %p3543_p2 = por %p3925_p0, %p56_p11  ;;  %p2677_p7 = scmp.lt.s32.totalorder %s3215_s24, 2 }
  0xc0   : > { %s3927_s30 = scalar_select %p3547_p6, 1, 0 }
  0xc1   : > { %s534_s1 = sand.u32 1, %s3211_s23   ;;  %p3553_p9 = por %p401_p5, %p56_p11 }
  0xc2   : > { %s2329_s9 = sshll.u32 %s534_s1, 4  ;;  %s2458_s16 = sshll.u32 %s3215_s24, 8 }
  0xc3   : > { %s3928_s26 = scalar_select %p3553_p9, 1, 0 }
  0xc4   : > { %s3929_s19 = sld [smem:[#allocation23_spill]]  ;;  %s538_s11 = scalar_lea.vmem [#allocation2], %s2329_s9 }
  0xc5   : > { %s545_s13 = sshll.u32 %s538_s11, 4  ;;  %p3563_p4 = pnand %p2677_p7, %p52_p13  ;;  %s3567_s13 = int_to_ptr.vmem [resolvable:$true] %s545_s13 }
  0xc6   : > { %s3569_s10 = scalar_lea.sflag [#allocation3], %s534_s1 }
  0xc7   : > { %p3105_p8 = pneg %p3563_p4 }
  0xca   : > { %s3561_s20 = scalar_lea.hbm %s3929_s19, %s2458_s16  ;;  %s3108_s18 = scalar_lea.hbm %s3929_s19, 512 }
  0xcb   : > { %s3103_s7 = scalar_lea.hbm %s3561_s20, 256  ;;  %p3109_p11 = scmp.lt.u32.totalorder %s3561_s20, %s3929_s19 }
  0xcc   : > { %p3104_p10 = scmp.ne.s32.totalorder %s3561_s20, %s3103_s7  ;;  %p3110_p12 = scmp.lt.u32.totalorder %s3108_s18, %s3103_s7 }
  0xcd   : > { %p3112_p0 = scmp.lt.u32.totalorder %s3103_s7, %s3561_s20 }
  0xce   : > { %p3106_p1 = pnand %p3105_p8, %p3104_p10  ;;  %p3111_p13 = por %p3110_p12, %p3109_p11 }
  0xd0   : > { %p3107_p3 = pneg %p3106_p1  ;;  %p3113_p5 = por %p3112_p0, %p3111_p13 }
  0xd2   : > { %p3114_p7 = pnand %p3113_p5, %p3107_p3 }
  0xd4   : > { %3117 = shalt.err (!%p3114_p7)
}
  0xd5   : > { %s3118_s1 = scalar_lea.vmem %s3567_s13, 256  ;;  %s3232_s9 = smov [#allocation2]  }
  0xd6   : > { %p3119_p10 = scmp.ne.s32.totalorder %s3567_s13, %s3118_s1  ;;  %s3123_s16 = sshll.u32 %s3232_s9, 4  ;;  %s3124_s16 = int_to_ptr.vmem [resolvable:$false] %s3123_s16 }
  0xd7   : > { %s3125_s17 = scalar_lea.vmem %s3124_s16, 512  ;;  %p3126_p6 = scmp.lt.s32.totalorder %s3567_s13, %s3124_s16 }
  0xd8   : > { %p3121_p1 = pnand %p3119_p10, %p3105_p8  ;;  %p3127_p11 = scmp.lt.s32.totalorder %s3125_s17, %s3118_s1 }
  0xda   : > { %p3122_p9 = pneg %p3121_p1  ;;  %p3128_p12 = por %p3127_p11, %p3126_p6 }
  0xdc   : > { %p3129_p13 = pnand %p3128_p12, %p3122_p9 }
  0xde   : > { %3132 = shalt.err (!%p3129_p13)
}
  0xdf   : > { %s3931_s7 = smov 8   ;;  %s3932_s18 = smov 128  }
  0xe0   : > { %2665 = dma.hbm_to_vmem [thread:$0]  (!%p3563_p4), %s3561_s20, 256, %s3567_s13, %s3569_s10, %s3932_s18, %s3932_s18, %s3931_s7  }
  0xe1   : > { %p3933_p8 = scmp.ne.s32.totalorder %s3919_s28, 0 }
  0xe2   : > { %s3603_s11 = sand.u32 (!%p3933_p8), 1, %s3207_s22  }
  0xe3   : > { %557 = sbr.rel (%p3933_p8) target bundleno = 3024 (0xbd0), region = 84  ;;  %s2333_s1 = sshll.u32 (!%p3933_p8), %s3603_s11, 4 }
  0xe4   : > { %s560_s9 = scalar_lea.sflag (!%p3933_p8), [#allocation3], %s3603_s11  ;;  %s563_s0 = scalar_lea.vmem (!%p3933_p8), [#allocation2], %s2333_s1 }
  0xea   : > { %3178 = dma.done.wait (%p3543_p2), %s560_s9, 256  }
  0xeb   : > { %3180 = vsyncadd (%p3543_p2), %s560_s9, 4294967040  ;;  %p3934_p6 = scmp.eq.s32.totalorder %s3346_s27, 0 }
  0xed   : > { %3182 = dma.done.wait (%p3934_p6), [#allocation6], 400   ;;  %p3935_p9 = pmov %p3934_p6 }
  0xee   : > { %p3936_p4 = pmov %p3934_p6 }
  0xef   : > { %3184 = vsyncadd (%p3935_p9), [#allocation6], 4294966896 }
  0xf0   : > { %3186 = dma.done.wait (%p3936_p4), [#allocation9], 3328   ;;  %p3937_p3 = pmov %p3936_p4 }
  0xf2   : > { %3188 = vsyncadd (%p3937_p3), [#allocation9], 4294963968  ;;  %p3938_p0 = pmov %p3937_p3 }
  0xf4   : > { %3190 = dma.done.wait (%p3938_p0), [#allocation12], 5120   ;;  %p3939_p5 = pmov %p3938_p0 }
  0xf5   : > { %p3940_p2 = pmov %p3938_p0 }
  0xf6   : > { %3192 = vsyncadd (%p3939_p5), [#allocation12], 4294962176 }
  0xf7   : > { %3194 = dma.done.wait (%p3940_p2), [#allocation15], 4096   ;;  %p3941_p7 = pmov %p3938_p0 }
  0xf8   : > { %v3233_v0 = vmov 0.0   ;;  %vm3234_vm0 = vmmov 0   ;;  %v2744_v1 = vld [vmem:[#allocation5] sm:$0xff]   ;;  %v2745_v2 = vld [vmem:[#allocation5 + $0x8] sm:$0xff]   ;;  %v2746_v3 = vld [vmem:[#allocation5 + $0x10] sm:$0xff]   ;;  %vm675_vm1 = vcmask 392192  }
  0xf9   : > { %3196 = vsyncadd (%p3941_p7), [#allocation15], 4294963200  ;;  %2534 = vmatprep.subr.bf16.mxu1 %v3233_v0  ;;  %2540 = vmatprep.mubr.msk.bf16.mxu1 %vm3234_vm0, %v3233_v0  ;;  %v641_v4 = vld [vmem:[%s563_s0] sm:$0xff]  ;;  %v642_v5 = vld [vmem:[%s563_s0 + $0x8] sm:$0xff]  ;;  %v3235_v50 = vmov 0   ;;  %s3942_s17 = sld [smem:[#allocation25_spill]] }
  0xfa   : > { %2544 = vmatprep.subr.bf16.mxu0 %v3233_v0  ;;  %2560 = vmatprep.mubr.msk.bf16.mxu0 %vm3234_vm0, %v3233_v0  ;;  %v643_v6 = vpack.c.bf16 %v642_v5, %v641_v4  ;;  %v2342_v7 = vld [vmem:[#allocation7] ss:$0 sm:$0xff]  ;;  %v720_v9 = vld [vmem:[#allocation8] sm:$0xff]  ;;  %v721_v16 = vld [vmem:[#allocation8 + $0x8] sm:$0xff]  ;;  %v817_v5 = vlaneseq  ;;  %vm1047_vm2 = vcmask 523264   ;;  %s3236_s7 = smov 64  }
  0xfb   : > { %2535 = vmatpush3.bf16.msra.mxu1 %v2744_v1  ;;  %v2747_v18 = vld [vmem:[#allocation10] ss:$12 sps:$4 sm:$0xff]   ;;  %v2749_v19 = vld [vmem:[#allocation10 + $0x4] ss:$12 sps:$4 sm:$0xff]   ;;  %v2750_v20 = vld [vmem:[#allocation10 + $0x8] ss:$12 sps:$4 sm:$0xff]  }
  0xfc   : > { %2536 = vmatprep.subr.bf16.mxu1 %v3233_v0  ;;  %v2753_v21 = vld [vmem:[#allocation10 + $0x1c] ss:$12 sps:$4 sm:$0xff]   ;;  %2545 = vmatpush3.bf16.msra.mxu0 %v2750_v20  ;;  %v2751_v22 = vld [vmem:[#allocation10 + $0x18] ss:$12 sps:$4 sm:$0xff]   ;;  %v2754_v31 = vld [vmem:[#allocation10 + $0x20] ss:$12 sps:$4 sm:$0xff]  }
  0xfd   : > { %2546 = vmatprep.subr.bf16.mxu0 %v3233_v0  ;;  %v2757_v32 = vld [vmem:[#allocation10 + $0x34] ss:$12 sps:$4 sm:$0xff]   ;;  %v2755_v33 = vld [vmem:[#allocation10 + $0x30] ss:$12 sps:$4 sm:$0xff]   ;;  %v2758_v34 = vld [vmem:[#allocation10 + $0x38] ss:$12 sps:$4 sm:$0xff]  }
  0xfe   : > { %v2761_v35 = vld [vmem:[#allocation10 + $0x4c] ss:$12 sps:$4 sm:$0xff]   ;;  %v2759_v36 = vld [vmem:[#allocation10 + $0x48] ss:$12 sps:$4 sm:$0xff]   ;;  %v2762_v37 = vld [vmem:[#allocation10 + $0x50] ss:$12 sps:$4 sm:$0xff]  }
  0xff   : > { %2537 = vmatpush3.bf16.msra.mxu1 %v2745_v2  ;;  %v2765_v38 = vld [vmem:[#allocation10 + $0x64] ss:$12 sps:$4 sm:$0xff]   ;;  %v2763_v39 = vld [vmem:[#allocation10 + $0x60] ss:$12 sps:$4 sm:$0xff]   ;;  %v2766_v40 = vld [vmem:[#allocation10 + $0x68] ss:$12 sps:$4 sm:$0xff]  }
 0x100   : > { %2538 = vmatprep.subr.bf16.mxu1 %v3233_v0  ;;  %2547 = vmatpush3.bf16.msra.mxu0 %v2754_v31  ;;  %v2769_v41 = vld [vmem:[#allocation10 + $0x7c] ss:$12 sps:$4 sm:$0xff]   ;;  %v2767_v42 = vld [vmem:[#allocation10 + $0x78] ss:$12 sps:$4 sm:$0xff]   ;;  %v2770_v43 = vld [vmem:[#allocation10 + $0x80] ss:$12 sps:$4 sm:$0xff]  }
 0x101   : > { %2548 = vmatprep.subr.bf16.mxu0 %v3233_v0  ;;  %v2773_v44 = vld [vmem:[#allocation10 + $0x94] ss:$12 sps:$4 sm:$0xff]   ;;  %v2771_v45 = vld [vmem:[#allocation10 + $0x90] ss:$12 sps:$4 sm:$0xff]   ;;  %v2774_v46 = vld [vmem:[#allocation10 + $0x98] ss:$12 sps:$4 sm:$0xff]  }
 0x102   : > { %v2777_v47 = vld [vmem:[#allocation10 + $0xac] ss:$12 sps:$4 sm:$0xff]   ;;  %v2775_v48 = vld [vmem:[#allocation10 + $0xa8] ss:$12 sps:$4 sm:$0xff]   ;;  %v2778_v49 = vld [vmem:[#allocation10 + $0xb0] ss:$12 sps:$4 sm:$0xff]  }
 0x103   : > { %2539 = vmatpush3.bf16.msra.mxu1 %v2746_v3  ;;  %v2347_v59 = vld [vmem:[%s3887_s4] ss:$0 sm:$0xff]  ;;  %vm1097_vm3 = vcmask 130048   ;;  %s3943_s0 = sld [smem:[#allocation26_spill]]  ;;  %s3944_s20 = sld [smem:[#allocation27_spill]] }
 0x104   : > { %960 = vmatprep.subr.bf16.mxu1 %v2749_v19  ;;  %2549 = vmatpush3.bf16.msra.mxu0 %v2758_v34  ;;  %v2348_v63 = vld [vmem:[%s3888_s5] ss:$0 sm:$0xff]  ;;  %s3945_s16 = sld [smem:[#allocation28_spill]]  ;;  %s3946_s18 = sld [smem:[#allocation29_spill]] }
 0x105   : > { %2550 = vmatprep.subr.bf16.mxu0 %v3233_v0  ;;  %s3947_s28 = sld [smem:[#allocation30_spill]]  ;;  %s639_s15 = scalar_lea.vmem [#allocation16], %s2333_s1 }
 0x106   : > { %2541 = vmatmul.mubr.msk.bf16.vlgmr.msra.gmra.mrb[0].mxu1 %vm675_vm1, %v643_v6  ;;  %v3675_v6 = vshrl.u32 %v817_v5, 7  ;;  %s2459_s13 = sshll.u32 %s3346_s27, 8  ;;  %s2166_s1 = scalar_lea.sflag [#allocation4], %s3603_s11 }
 0x107   : > { %961 = vmatpush1.bf16.msra.mxu1 %v2747_v18  ;;  %992 = vmatprep.mubr.bf16.mxu1 %v3235_v50  ;;  %p3949_p1 = scmp.ne.s32.totalorder %s3927_s30, 0  ;;  %s3237_s27 = smov [#allocation16]  }
 0x108   : > { %962 = vmatprep.subr.bf16.mxu1 %v2753_v21  ;;  %2551 = vmatpush3.bf16.msra.mxu0 %v2762_v37  ;;  %s3137_s9 = sshll.u32 %s3237_s27, 4  ;;  %s3138_s9 = int_to_ptr.vmem [resolvable:$false] %s3137_s9 }
 0x109   : > { %2552 = vmatprep.subr.bf16.mxu0 %v3233_v0 }
 0x10b   : > { %963 = vmatpush1.bf16.msra.mxu1 %v2751_v22 }
 0x10c   : > { %964 = vmatprep.subr.bf16.mxu1 %v2757_v32  ;;  %2553 = vmatpush3.bf16.msra.mxu0 %v2766_v40 }
 0x10d   : > { %2554 = vmatprep.subr.bf16.mxu0 %v3233_v0 }
 0x10f   : > { %965 = vmatpush1.bf16.msra.mxu1 %v2755_v33 }
 0x110   : > { %966 = vmatprep.subr.bf16.mxu1 %v2761_v35  ;;  %2555 = vmatpush3.bf16.msra.mxu0 %v2770_v43 }
 0x111   : > { %2556 = vmatprep.subr.bf16.mxu0 %v3233_v0 }
 0x113   : > { %967 = vmatpush1.bf16.msra.mxu1 %v2759_v36 }
 0x114   : > { %968 = vmatprep.subr.bf16.mxu1 %v2765_v38  ;;  %2557 = vmatpush3.bf16.msra.mxu0 %v2774_v46 }
 0x115   : > { %2558 = vmatprep.subr.bf16.mxu0 %v3233_v0 }
 0x117   : > { %969 = vmatpush1.bf16.msra.mxu1 %v2763_v39 }
 0x118   : > { %970 = vmatprep.subr.bf16.mxu1 %v2769_v41  ;;  %2559 = vmatpush3.bf16.msra.mxu0 %v2778_v49 }
 0x119   : > { %2576 = vmatprep.subr.bf16.mxu0 %v3233_v0 }
 0x11b   : > { %971 = vmatpush1.bf16.msra.mxu1 %v2767_v42 }
 0x11c   : > { %972 = vmatprep.subr.bf16.mxu1 %v2773_v44 }
 0x11f   : > { %973 = vmatpush1.bf16.msra.mxu1 %v2771_v45 }
 0x120   : > { %974 = vmatprep.subr.bf16.mxu1 %v2777_v47 }
 0x123   : > { %975 = vmatpush1.bf16.msra.mxu1 %v2775_v48 }
 0x124   : > { %2564 = vmatprep.subr.bf16.mxu1 %v3233_v0 }
 0x1d9   : > { %v713_v8 = vpop.f32.mrb[0].mxu1 }
 0x1da   : > { %v714_v10 = vadd.f32 %v2342_v7, %v713_v8  ;;  %v2542_v11 = vpop.f32.mrb[1].mxu1  ;;  %v827_v8 = vsub.s32 2, %v3675_v6 }
 0x1db   : > { %v716_v12 = vpop.f32.mrb[2].mxu1 }
 0x1dc   : > { %v3637_v13 = vadd.f32 %v720_v9, %v714_v10  ;;  %v717_v14 = vadd.f32 %v2342_v7, %v716_v12  ;;  %v2543_v15 = vpop.f32.mrb[3].mxu1  ;;  %v819_v7 = vsub.s32 0, %v3675_v6  ;;  %v797_v9 = vld [vmem:[%s3942_s17] sm:$0x7]  ;;  %v823_v10 = vsub.s32 1, %v3675_v6  ;;  %s3948_s17 = sld [smem:[#allocation31_spill]] }
 0x1dd   : > { %v828_v12 = vrot.slane %v797_v9, %v827_v8 }
 0x1de   : > { %726 = vadd.xlane.f32.xlu0 %v3637_v13  ;;  %v3640_v17 = vadd.f32 %v721_v16, %v717_v14  ;;  %v820_v11 = vrot.slane %v797_v9, %v819_v7  ;;  %v824_v16 = vrot.slane %v797_v9, %v823_v10 }
 0x1e2   : > { %728 = vadd.xlane.f32.xlu0 %v3640_v17 }
 0x26b   : > { %v727_v23 = vpop.xlane.xlu0 %726 }
 0x26c   : > { %v731_v24 = vmul.f32 0.0078125, %v727_v23 }
 0x26e   : > { %v3645_v25 = vsub.f32 %v3637_v13, %v731_v24 }
 0x26f   : > { %v729_v26 = vpop.xlane.xlu0 %728 }
 0x270   : > { %v732_v27 = vmul.f32 0.0078125, %v729_v26  ;;  %v735_v28 = vmul.f32 %v3645_v25, %v3645_v25 }
 0x272   : > { %v3650_v29 = vsub.f32 %v3640_v17, %v732_v27  ;;  %737 = vadd.xlane.f32.xlu1 %v735_v28 }
 0x274   : > { %v736_v30 = vmul.f32 %v3650_v29, %v3650_v29 }
 0x276   : > { %739 = vadd.xlane.f32.xlu1 %v736_v30 }
 0x2ff   : > { %v738_v51 = vpop.xlane.xlu1 %737 }
 0x300   : > { %v741_v52 = vmul.f32 0.0078125, %v738_v51 }
 0x302   : > { %v743_v53 = vadd.f32 1e-05, %v741_v52 }
 0x303   : > { %v740_v54 = vpop.xlane.xlu1 %739 }
 0x304   : > { %2867 = vrsqrt.f32 %v743_v53  ;;  %v742_v55 = vmul.f32 0.0078125, %v740_v54 }
 0x306   : > { %v744_v56 = vadd.f32 1e-05, %v742_v55 }
 0x308   : > { %2869 = vrsqrt.f32 %v744_v56 }
 0x30e   : > { %v2868_v57 = vpop.eup %2867 }
 0x30f   : > { %v747_v58 = vmul.f32 %v2868_v57, %v3645_v25 }
 0x311   : > { %v755_v62 = vmul.f32 %v2347_v59, %v747_v58 }
 0x312   : > { %v2870_v60 = vpop.eup %2869 }
 0x313   : > { %v748_v61 = vmul.f32 %v2870_v60, %v3650_v29  ;;  %v763_v2 = vadd.f32 %v2348_v63, %v755_v62 }
 0x315   : > { %v756_v1 = vmul.f32 %v2347_v59, %v748_v61 }
 0x317   : > { %v764_v3 = vadd.f32 %v2348_v63, %v756_v1 }
 0x319   : > { %v815_v4 = vpack.c.bf16 %v764_v3, %v763_v2 }
 0x31b   : > { %993 = vmatmul.mubr.bf16.vlgmr.msra.gmra.mrb[4].mxu1 %v815_v4  ;;  %2561 = vmatmul.mubr.bf16.vlgmr.msra.gmra.mrb[0].mxu0 %v815_v4 }
 0x31c   : > { %2566 = vmatprep.mubr.msk.bf16.mxu1 %vm3234_vm0, %v3233_v0  ;;  %2578 = vmatprep.mubr.msk.bf16.mxu0 %vm3234_vm0, %v3233_v0 }
 0x3ee   : > { %v994_v14 = vpop.f32.mrb[4].mxu1  ;;  %v1037_v15 = vpop.f32.mrb[0].mxu0 }
 0x3ef   : > { %v996_v18 = vpop.f32.mrb[5].mxu1  ;;  %v2562_v19 = vpop.f32.mrb[1].mxu0  ;;  %v995_v22 = vadd.f32 %v994_v14, %v820_v11  ;;  %v1038_v23 = vadd.f32 %v1037_v15, %v828_v12 }
 0x3f0   : > { %v998_v20 = vpop.f32.mrb[6].mxu1  ;;  %v1040_v21 = vpop.f32.mrb[2].mxu0  ;;  %v997_v28 = vadd.f32 %v996_v18, %v824_v16 }
 0x3f1   : > { %v999_v24 = vadd.f32 %v998_v20, %v820_v11  ;;  %v1041_v25 = vadd.f32 %v1040_v21, %v828_v12  ;;  %v1000_v26 = vpop.f32.mrb[7].mxu1  ;;  %v2563_v27 = vpop.f32.mrb[3].mxu0 }
 0x3f2   : > { %v1001_v29 = vadd.f32 %v1000_v26, %v824_v16 }
 0x3f3   : > { %v1044_v30 = vpack.c.bf16 %v999_v24, %v995_v22  ;;  %v3689_v31 = vpack.c.bf16 %v1041_v25, %v1038_v23 }
 0x3f4   : > { %v1045_v32 = vpack.c.bf16 %v1001_v29, %v997_v28 }
 0x3f5   : > { %1166 = vrot.lane.b32.xlu1 %v1044_v30, %s3236_s7 }
 0x3f6   : > { %1169 = vrot.lane.b32.xlu0 %v1045_v32, %s3236_s7  ;;  %v1052_v33 = vsel %vm1047_vm2, %v1045_v32, 0  ;;  %v2779_v32 = vld [vmem:[#allocation11] sm:$0xff]  }
 0x3f7   : > { %2565 = vmatpush3.bf16.xpose.msra.mxu1 %v1052_v33  ;;  %v2780_v33 = vld [vmem:[#allocation11 + $0x8] sm:$0xff]  }
 0x3f8   : > { %2570 = vmatprep.subr.bf16.mxu1 %v3233_v0 }
 0x3fe   : > { %2567 = vmatmul.mubr.msk.bf16.vlgmr.msra.gmra.mrb[8].mxu1 %vm1047_vm2, %v1044_v30 }
 0x3ff   : > { %2571 = vmatpush3.bf16.msra.mxu1 %v3689_v31  ;;  %2572 = vmatprep.mubr.msk.bf16.mxu1 %vm3234_vm0, %v3233_v0 }
 0x400   : > { %2582 = vmatprep.subr.bf16.mxu1 %v3233_v0 }
 0x467   : > { %v1167_v36 = vpop.permute.xlu1 %1166 }
 0x468   : > { %v1170_v34 = vpop.permute.xlu0 %1169 }
 0x469   : > { %v1175_v35 = vsel %vm1047_vm2, %v1170_v34, 0  ;;  %v2781_v34 = vld [vmem:[#allocation11 + $0x10] sm:$0xff]  }
 0x46a   : > { %2577 = vmatpush3.bf16.xpose.msra.mxu0 %v1175_v35 }
 0x46b   : > { %2588 = vmatprep.subr.bf16.mxu0 %v3233_v0 }
 0x471   : > { %2579 = vmatmul.mubr.msk.bf16.vlgmr.msra.gmra.mrb[4].mxu0 %vm1047_vm2, %v1167_v36 }
 0x472   : > { %2604 = vmatprep.mubr.msk.bf16.mxu0 %vm3234_vm0, %v3233_v0  ;;  %2589 = vmatpush3.bf16.msra.mxu0 %v2779_v32  ;;  %v2819_v32 = vld [vmem:[#allocation13 + $0xa4] ss:$16 sps:$4 sm:$0xff]  }
 0x473   : > { %2590 = vmatprep.subr.bf16.mxu0 %v3233_v0 }
 0x476   : > { %2591 = vmatpush3.bf16.msra.mxu0 %v2780_v33  ;;  %v2822_v33 = vld [vmem:[#allocation13 + $0xac] ss:$16 sps:$4 sm:$0xff]  }
 0x477   : > { %2592 = vmatprep.subr.bf16.mxu0 %v3233_v0 }
 0x47a   : > { %2593 = vmatpush3.bf16.msra.mxu0 %v2781_v34  ;;  %v2817_v34 = vld [vmem:[#allocation13 + $0xa0] ss:$16 sps:$4 sm:$0xff]  }
 0x47b   : > { %2594 = vmatprep.subr.bf16.mxu0 %v3233_v0 }
 0x4d1   : > { %v1088_v37 = vpop.f32.mrb[8].mxu1 }
 0x4d2   : > { %v1095_v38 = vmul.f32 0.125, %v1088_v37  ;;  %v2568_v39 = vpop.f32.mrb[9].mxu1 }
 0x4d3   : > { %v1091_v40 = vpop.f32.mrb[10].mxu1 }
 0x4d4   : > { %v1096_v41 = vmul.f32 0.125, %v1091_v40  ;;  %v2569_v42 = vpop.f32.mrb[11].mxu1  ;;  %v1098_v43 = vsel %vm1097_vm3, %v1095_v38, -inf  ;;  %v2783_v40 = vld [vmem:[#allocation11 + $0x20] sm:$0xff]  }
 0x4d5   : > { %1099 = vmax.xlane.f32.xlu1 %v1098_v43  ;;  %v2785_v42 = vld [vmem:[#allocation11 + $0x30] sm:$0xff]   ;;  %v2786_v43 = vld [vmem:[#allocation11 + $0x38] sm:$0xff]  }
 0x4d6   : > { %v1101_v44 = vsel %vm1097_vm3, %v1096_v41, -inf }
 0x4d7   : > { %1102 = vmax.xlane.f32.xlu0 %v1101_v44 }
 0x544   : > { %v1211_v45 = vpop.f32.mrb[4].mxu0 }
 0x545   : > { %v1218_v46 = vmul.f32 0.125, %v1211_v45  ;;  %v2580_v47 = vpop.f32.mrb[5].mxu0 }
 0x546   : > { %v1214_v48 = vpop.f32.mrb[6].mxu0 }
 0x547   : > { %v1219_v49 = vmul.f32 0.125, %v1214_v48  ;;  %v2581_v51 = vpop.f32.mrb[7].mxu0  ;;  %v1220_v52 = vsel %vm1097_vm3, %v1218_v46, -inf }
 0x548   : > { %1221 = vmax.xlane.f32.xlu0 %v1220_v52 }
 0x549   : > { %v1223_v53 = vsel %vm1097_vm3, %v1219_v49, -inf }
 0x54a   : > { %1224 = vmax.xlane.f32.xlu1 %v1223_v53 }
 0x562   : > { %v1100_v54 = vpop.xlane.xlu1 %1099 }
 0x563   : > { %v1104_v55 = vsub.f32 %v1095_v38, %v1100_v54  ;;  %v2782_v38 = vld [vmem:[#allocation11 + $0x18] sm:$0xff]  }
 0x564   : > { %v1103_v56 = vpop.xlane.xlu0 %1102  ;;  %2595 = vmatpush3.bf16.msra.mxu0 %v2782_v38  ;;  %v2823_v38 = vld [vmem:[#allocation13 + $0xc0] ss:$16 sps:$4 sm:$0xff]  }
 0x565   : > { %v1106_v57 = vmul.f32 1.442695, %v1104_v55  ;;  %v1105_v58 = vsub.f32 %v1096_v41, %v1103_v56  ;;  %2596 = vmatprep.subr.bf16.mxu0 %v3233_v0  ;;  %v2784_v41 = vld [vmem:[#allocation11 + $0x28] sm:$0xff]  }
 0x567   : > { %2871 = vpow2.f32 %v1106_v57  ;;  %v1108_v59 = vmul.f32 1.442695, %v1105_v58 }
 0x568   : > { %2597 = vmatpush3.bf16.msra.mxu0 %v2783_v40  ;;  %v2831_v40 = vld [vmem:[#allocation13 + $0xe4] ss:$16 sps:$4 sm:$0xff]  }
 0x569   : > { %2873 = vpow2.f32 %v1108_v59  ;;  %2598 = vmatprep.subr.bf16.mxu0 %v3233_v0 }
 0x56c   : > { %2599 = vmatpush3.bf16.msra.mxu0 %v2784_v41  ;;  %v2829_v41 = vld [vmem:[#allocation13 + $0xe0] ss:$16 sps:$4 sm:$0xff]  }
 0x56d   : > { %2600 = vmatprep.subr.bf16.mxu0 %v3233_v0 }
 0x570   : > { %2601 = vmatpush3.bf16.msra.mxu0 %v2785_v42  ;;  %v2832_v42 = vld [vmem:[#allocation13 + $0xe8] ss:$16 sps:$4 sm:$0xff]  }
 0x571   : > { %v2872_v60 = vpop.eup %2871  ;;  %2602 = vmatprep.subr.bf16.mxu0 %v3233_v0 }
 0x572   : > { %v1110_v61 = vsel %vm1097_vm3, %v2872_v60, 0.0 }
 0x573   : > { %v2874_v62 = vpop.eup %2873  ;;  %1111 = vadd.xlane.f32.xlu0 %v1110_v61 }
 0x574   : > { %v1113_v63 = vsel %vm1097_vm3, %v2874_v62, 0.0  ;;  %2603 = vmatpush3.bf16.msra.mxu0 %v2786_v43  ;;  %v2834_v43 = vld [vmem:[#allocation13 + $0xec] ss:$16 sps:$4 sm:$0xff]  }
 0x575   : > { %1114 = vadd.xlane.f32.xlu1 %v1113_v63 }
 0x5d5   : > { %v1222_v1 = vpop.xlane.xlu0 %1221 }
 0x5d6   : > { %v1226_v2 = vsub.f32 %v1218_v46, %v1222_v1  ;;  %v2789_v1 = vld [vmem:[#allocation13 + $0x4] ss:$16 sps:$4 sm:$0xff]  }
 0x5d7   : > { %v1225_v3 = vpop.xlane.xlu1 %1224 }
 0x5d8   : > { %v1228_v4 = vmul.f32 1.442695, %v1226_v2  ;;  %v1227_v5 = vsub.f32 %v1219_v49, %v1225_v3  ;;  %v2790_v2 = vld [vmem:[#allocation13 + $0x8] ss:$16 sps:$4 sm:$0xff]   ;;  %v2792_v3 = vld [vmem:[#allocation13 + $0xc] ss:$16 sps:$4 sm:$0xff]  }
 0x5d9   : > { %1762 = vmatprep.subr.bf16.mxu0 %v2792_v3  ;;  %v2839_v3 = vld [vmem:[#allocation14 + $0x48] sm:$0xff]  }
 0x5da   : > { %2875 = vpow2.f32 %v1228_v4  ;;  %v1230_v9 = vmul.f32 1.442695, %v1227_v5  ;;  %v2795_v4 = vld [vmem:[#allocation13 + $0x24] ss:$16 sps:$4 sm:$0xff]   ;;  %v2798_v5 = vld [vmem:[#allocation13 + $0x2c] ss:$16 sps:$4 sm:$0xff]  }
 0x5dc   : > { %2877 = vpow2.f32 %v1230_v9  ;;  %v2796_v9 = vld [vmem:[#allocation13 + $0x28] ss:$16 sps:$4 sm:$0xff]  }
 0x5e4   : > { %v2876_v11 = vpop.eup %2875 }
 0x5e5   : > { %v1232_v12 = vsel %vm1097_vm3, %v2876_v11, 0.0 }
 0x5e6   : > { %v2878_v14 = vpop.eup %2877  ;;  %1233 = vadd.xlane.f32.xlu0 %v1232_v12 }
 0x5e7   : > { %v1235_v15 = vsel %vm1097_vm3, %v2878_v14, 0.0 }
 0x5e8   : > { %1236 = vadd.xlane.f32.xlu1 %v1235_v15 }
 0x5fc   : > { %1244 = vrot.lane.b32.xlu0 %v3689_v31, %s3236_s7 }
 0x600   : > { %v1112_v16 = vpop.xlane.xlu0 %1111 }
 0x601   : > { %2879 = vrcp.f32 %v1112_v16 }
 0x602   : > { %v1115_v18 = vpop.xlane.xlu1 %1114 }
 0x603   : > { %2881 = vrcp.f32 %v1115_v18 }
 0x60b   : > { %v2880_v19 = vpop.eup %2879 }
 0x60c   : > { %v1118_v21 = vmul.f32 %v2880_v19, %v2872_v60 }
 0x60d   : > { %v2882_v20 = vpop.eup %2881 }
 0x60e   : > { %v1119_v22 = vmul.f32 %v2882_v20, %v2874_v62  ;;  %v2801_v20 = vld [vmem:[#allocation13 + $0x44] ss:$16 sps:$4 sm:$0xff]  }
 0x610   : > { %v1120_v23 = vpack.c.bf16 %v1119_v22, %v1118_v21  ;;  %v2804_v21 = vld [vmem:[#allocation13 + $0x4c] ss:$16 sps:$4 sm:$0xff]   ;;  %v2799_v22 = vld [vmem:[#allocation13 + $0x40] ss:$16 sps:$4 sm:$0xff]  }
 0x612   : > { %2573 = vmatmul.mubr.msk.bf16.vlgmr.msra.gmra.mrb[12].mxu1 %vm1097_vm3, %v1120_v23  ;;  %v2802_v23 = vld [vmem:[#allocation13 + $0x48] ss:$16 sps:$4 sm:$0xff]  }
 0x613   : > { %2584 = vmatprep.mubr.msk.bf16.mxu1 %vm3234_vm0, %v3233_v0  ;;  %v2377_v0 = vld [vmem:[%s3943_s0] ss:$0 sm:$0xff]  ;;  %s3139_s0 = scalar_lea.vmem %s3138_s9, 512 }
 0x673   : > { %v1234_v24 = vpop.xlane.xlu0 %1233 }
 0x674   : > { %2883 = vrcp.f32 %v1234_v24  ;;  %v2807_v24 = vld [vmem:[#allocation13 + $0x64] ss:$16 sps:$4 sm:$0xff]  }
 0x675   : > { %v1237_v25 = vpop.xlane.xlu1 %1236 }
 0x676   : > { %2885 = vrcp.f32 %v1237_v25  ;;  %v2810_v25 = vld [vmem:[#allocation13 + $0x6c] ss:$16 sps:$4 sm:$0xff]  }
 0x677   : > { %v1245_v26 = vpop.permute.xlu0 %1244 }
 0x678   : > { %2583 = vmatpush3.bf16.msra.mxu1 %v1245_v26  ;;  %v2805_v26 = vld [vmem:[#allocation13 + $0x60] ss:$16 sps:$4 sm:$0xff]  }
 0x679   : > { %1719 = vmatprep.subr.bf16.mxu1 %v2789_v1  ;;  %v2837_v1 = vld [vmem:[#allocation14] sm:$0xff]  }
 0x67e   : > { %v2884_v27 = vpop.eup %2883 }
 0x67f   : > { %v1240_v29 = vmul.f32 %v2884_v27, %v2876_v11  ;;  %v2808_v27 = vld [vmem:[#allocation13 + $0x68] ss:$16 sps:$4 sm:$0xff]  }
 0x680   : > { %v2886_v28 = vpop.eup %2885 }
 0x681   : > { %v1241_v30 = vmul.f32 %v2886_v28, %v2878_v14  ;;  %v2813_v28 = vld [vmem:[#allocation13 + $0x84] ss:$16 sps:$4 sm:$0xff]  }
 0x683   : > { %v1242_v31 = vpack.c.bf16 %v1241_v30, %v1240_v29  ;;  %v2816_v29 = vld [vmem:[#allocation13 + $0x8c] ss:$16 sps:$4 sm:$0xff]   ;;  %v2811_v30 = vld [vmem:[#allocation13 + $0x80] ss:$16 sps:$4 sm:$0xff]  }
 0x685   : > { %2585 = vmatmul.mubr.msk.bf16.vlgmr.msra.gmra.mrb[16].mxu1 %vm1097_vm3, %v1242_v31  ;;  %v2814_v31 = vld [vmem:[#allocation13 + $0x88] ss:$16 sps:$4 sm:$0xff]  }
 0x686   : > { %1751 = vmatprep.mubr.bf16.mxu1 %v3235_v50 }
 0x6e5   : > { %v1158_v35 = vpop.f32.mrb[12].mxu1 }
 0x6e6   : > { %v2574_v36 = vpop.f32.mrb[13].mxu1 }
 0x6e7   : > { %v1161_v37 = vpop.f32.mrb[14].mxu1  ;;  %v2825_v36 = vld [vmem:[#allocation13 + $0xc4] ss:$16 sps:$4 sm:$0xff]  }
 0x6e8   : > { %v2575_v39 = vpop.f32.mrb[15].mxu1 }
 0x6e9   : > { %v2826_v39 = vld [vmem:[#allocation13 + $0xc8] ss:$16 sps:$4 sm:$0xff]  }
 0x758   : > { %v1284_v44 = vpop.f32.mrb[16].mxu1 }
 0x759   : > { %v2586_v45 = vpop.f32.mrb[17].mxu1 }
 0x75a   : > { %v1287_v46 = vpop.f32.mrb[18].mxu1 }
 0x75b   : > { %v2739_v47 = vpack.i.bf16 %v1287_v46, %v1284_v44  ;;  %v2587_v48 = vpop.f32.mrb[19].mxu1 }
 0x75d   : > { %2740 = vrot.lane.b32.xlu1 %v2739_v47, %s3236_s7  ;;  %s3838_s7 = scalar_lea.hbm %s3948_s17, %s2459_s13 }
 0x7cf   : > { %v2741_v49 = vpop.permute.xlu1 %2740 }
 0x7d0   : > { %v2743_v51 = vunpack.i.h.bf16 %v2741_v49  ;;  %v2742_v52 = vunpack.i.l.bf16 %v2741_v49 }
 0x7d2   : > { %v1300_v53 = vsel %vm1047_vm2, %v1161_v37, %v2743_v51  ;;  %v1299_v54 = vsel %vm1047_vm2, %v1158_v35, %v2742_v52  ;;  %v2820_v35 = vld [vmem:[#allocation13 + $0xa8] ss:$16 sps:$4 sm:$0xff]   ;;  %v2828_v37 = vld [vmem:[#allocation13 + $0xcc] ss:$16 sps:$4 sm:$0xff]   ;;  %v2386_v52 = vld [vmem:[%s3944_s20] ss:$0 sm:$0xff] }
 0x7d3   : > { %v1301_v55 = vpack.c.bf16 %v1300_v53, %v1299_v54  ;;  %s2179_s20 = sshll.u32 %s639_s15, 4  ;;  %s3833_s20 = int_to_ptr.vmem [resolvable:$true] %s2179_s20 }
 0x7d4   : > { %p3140_p13 = scmp.lt.s32.totalorder %s3833_s20, %s3138_s9 }
 0x7d5   : > { %2605 = vmatmul.mubr.bf16.vlgmr.msra.gmra.mrb[8].mxu0 %v1301_v55 }
 0x7d6   : > { %1794 = vmatprep.mubr.bf16.mxu0 %v3235_v50  ;;  %v2787_v50 = vld [vmem:[#allocation13] ss:$16 sps:$4 sm:$0xff]   ;;  %1763 = vmatpush1.bf16.msra.mxu0 %v2790_v2 }
 0x7d7   : > { %1720 = vmatpush1.bf16.msra.mxu1 %v2787_v50  ;;  %1764 = vmatprep.subr.bf16.mxu0 %v2798_v5  ;;  %v2836_v50 = vld [vmem:[#allocation14 + $0xc0] sm:$0xff]   ;;  %v2841_v5 = vld [vmem:[#allocation14 + $0x8] sm:$0xff]  }
 0x7d8   : > { %1721 = vmatprep.subr.bf16.mxu1 %v2795_v4  ;;  %v2838_v2 = vld [vmem:[#allocation14 + $0x80] sm:$0xff]   ;;  %v2840_v4 = vld [vmem:[#allocation14 + $0xc8] sm:$0xff]  }
 0x7da   : > { %1765 = vmatpush1.bf16.msra.mxu0 %v2796_v9  ;;  %v2843_v9 = vld [vmem:[#allocation14 + $0x50] sm:$0xff]  }
 0x7db   : > { %1766 = vmatprep.subr.bf16.mxu0 %v2804_v21  ;;  %v2853_v21 = vld [vmem:[#allocation14 + $0x20] sm:$0xff]  }
 0x7de   : > { %1767 = vmatpush1.bf16.msra.mxu0 %v2802_v23  ;;  %v2855_v23 = vld [vmem:[#allocation14 + $0x68] sm:$0xff]  }
 0x7df   : > { %1768 = vmatprep.subr.bf16.mxu0 %v2810_v25  ;;  %v2857_v25 = vld [vmem:[#allocation14 + $0x28] sm:$0xff]  }
 0x7e2   : > { %1769 = vmatpush1.bf16.msra.mxu0 %v2808_v27  ;;  %v2859_v27 = vld [vmem:[#allocation14 + $0x70] sm:$0xff]  }
 0x7e3   : > { %1770 = vmatprep.subr.bf16.mxu0 %v2816_v29  ;;  %v2861_v29 = vld [vmem:[#allocation14 + $0x30] sm:$0xff]  }
 0x7e6   : > { %1771 = vmatpush1.bf16.msra.mxu0 %v2814_v31  ;;  %v2863_v31 = vld [vmem:[#allocation14 + $0x78] sm:$0xff]  }
 0x7e7   : > { %1772 = vmatprep.subr.bf16.mxu0 %v2822_v33  ;;  %v2865_v33 = vld [vmem:[#allocation14 + $0x38] sm:$0xff]  }
 0x7ea   : > { %1773 = vmatpush1.bf16.msra.mxu0 %v2820_v35  ;;  %v1471_v35 = vld [vmem:[%s3946_s18] sm:$0xf]  ;;  %s3133_s18 = scalar_lea.vmem %s3833_s20, 256 }
 0x7eb   : > { %1774 = vmatprep.subr.bf16.mxu0 %v2828_v37  ;;  %v1542_v37 = vrot.slane %v1471_v35, %v819_v7  ;;  %p3134_p10 = scmp.ne.s32.totalorder %s3833_s20, %s3133_s18  ;;  %p3141_p8 = scmp.lt.s32.totalorder %s3139_s0, %s3133_s18 }
 0x7ed   : > { %p3135_p11 = pnand %p3134_p10, %p3949_p1  ;;  %p3142_p6 = por %p3141_p8, %p3140_p13 }
 0x7ee   : > { %1775 = vmatpush1.bf16.msra.mxu0 %v2826_v39  ;;  %v1546_v39 = vrot.slane %v1471_v35, %v823_v10 }
 0x7ef   : > { %1776 = vmatprep.subr.bf16.mxu0 %v2834_v43  ;;  %p3136_p12 = pneg %p3135_p11 }
 0x7f1   : > { %p3143_p9 = pnand %p3142_p6, %p3136_p12 }
 0x7f2   : > { %1777 = vmatpush1.bf16.msra.mxu0 %v2832_v42 }
 0x7f3   : > { %2512 = vmatprep.subr.bf16.mxu0 %v2836_v50 }
 0x8a8   : > { %v1390_v56 = vpop.f32.mrb[8].mxu0 }
 0x8a9   : > { %v1391_v57 = vadd.f32 %v2377_v0, %v1390_v56  ;;  %v2606_v58 = vpop.f32.mrb[9].mxu0  ;;  %v2387_v56 = vld [vmem:[%s3945_s16] ss:$0 sm:$0xff] }
 0x8aa   : > { %v1393_v59 = vpop.f32.mrb[10].mxu0 }
 0x8ab   : > { %v3735_v60 = vadd.f32 %v1391_v57, %v3637_v13  ;;  %v1394_v61 = vadd.f32 %v2377_v0, %v1393_v59  ;;  %v2607_v62 = vpop.f32.mrb[11].mxu0  ;;  %v2793_v13 = vld [vmem:[#allocation13 + $0x20] ss:$16 sps:$4 sm:$0xff]  }
 0x8ac   : > { %1722 = vmatpush1.bf16.msra.mxu1 %v2793_v13  ;;  %v2835_v62 = vld [vmem:[#allocation14 + $0x40] sm:$0xff]   ;;  %v2842_v13 = vld [vmem:[#allocation14 + $0x88] sm:$0xff]  }
 0x8ad   : > { %v3738_v63 = vadd.f32 %v1394_v61, %v3640_v17  ;;  %1401 = vadd.xlane.f32.xlu1 %v3735_v60  ;;  %1723 = vmatprep.subr.bf16.mxu1 %v2801_v20  ;;  %v2852_v20 = vld [vmem:[#allocation14 + $0xe0] sm:$0xff]  }
 0x8af   : > { %1403 = vadd.xlane.f32.xlu0 %v3738_v63 }
 0x8b0   : > { %1724 = vmatpush1.bf16.msra.mxu1 %v2799_v22  ;;  %v2854_v22 = vld [vmem:[#allocation14 + $0xa0] sm:$0xff]  }
 0x8b1   : > { %1725 = vmatprep.subr.bf16.mxu1 %v2807_v24  ;;  %v2856_v24 = vld [vmem:[#allocation14 + $0xe8] sm:$0xff]  }
 0x8b4   : > { %1726 = vmatpush1.bf16.msra.mxu1 %v2805_v26  ;;  %v2858_v26 = vld [vmem:[#allocation14 + $0xa8] sm:$0xff]  }
 0x8b5   : > { %1727 = vmatprep.subr.bf16.mxu1 %v2813_v28  ;;  %v2860_v28 = vld [vmem:[#allocation14 + $0xf0] sm:$0xff]  }
 0x8b8   : > { %1728 = vmatpush1.bf16.msra.mxu1 %v2811_v30  ;;  %v2862_v30 = vld [vmem:[#allocation14 + $0xb0] sm:$0xff]  }
 0x8b9   : > { %1729 = vmatprep.subr.bf16.mxu1 %v2819_v32  ;;  %v2864_v32 = vld [vmem:[#allocation14 + $0xf8] sm:$0xff]  }
 0x8bc   : > { %1730 = vmatpush1.bf16.msra.mxu1 %v2817_v34  ;;  %v2866_v34 = vld [vmem:[#allocation14 + $0xb8] sm:$0xff]  }
 0x8bd   : > { %1731 = vmatprep.subr.bf16.mxu1 %v2825_v36  ;;  %v1553_v36 = vsub.s32 3, %v3675_v6 }
 0x8c0   : > { %1732 = vmatpush1.bf16.msra.mxu1 %v2823_v38  ;;  %v1550_v38 = vrot.slane %v1471_v35, %v827_v8 }
 0x8c1   : > { %1733 = vmatprep.subr.bf16.mxu1 %v2831_v40  ;;  %v1554_v40 = vrot.slane %v1471_v35, %v1553_v36 }
 0x8c4   : > { %1734 = vmatpush1.bf16.msra.mxu1 %v2829_v41 }
 0x8c5   : > { %2490 = vmatprep.subr.bf16.mxu1 %v2835_v62 }
 0x93a   : > { %v1402_v17 = vpop.xlane.xlu1 %1401 }
 0x93b   : > { %v1405_v11 = vmul.f32 0.0078125, %v1402_v17  ;;  %v2844_v17 = vld [vmem:[#allocation14 + $0xd0] sm:$0xff]  }
 0x93c   : > { %v1404_v12 = vpop.xlane.xlu0 %1403 }
 0x93d   : > { %v3743_v14 = vsub.f32 %v3735_v60, %v1405_v11  ;;  %v1406_v15 = vmul.f32 0.0078125, %v1404_v12  ;;  %v2845_v11 = vld [vmem:[#allocation14 + $0x10] sm:$0xff]  }
 0x93e   : > { %v2846_v12 = vld [vmem:[#allocation14 + $0x90] sm:$0xff]  }
 0x93f   : > { %v3746_v16 = vsub.f32 %v3738_v63, %v1406_v15  ;;  %v1409_v18 = vmul.f32 %v3743_v14, %v3743_v14  ;;  %v2848_v15 = vld [vmem:[#allocation14 + $0xd8] sm:$0xff]  }
 0x941   : > { %1411 = vadd.xlane.f32.xlu0 %v1409_v18  ;;  %v1410_v19 = vmul.f32 %v3746_v16, %v3746_v16  ;;  %v2850_v18 = vld [vmem:[#allocation14 + $0x98] sm:$0xff]  }
 0x943   : > { %1413 = vadd.xlane.f32.xlu1 %v1410_v19  ;;  %v2851_v19 = vld [vmem:[#allocation14 + $0x60] sm:$0xff]  }
 0x9ce   : > { %v1412_v44 = vpop.xlane.xlu0 %1411 }
 0x9cf   : > { %v1415_v45 = vmul.f32 0.0078125, %v1412_v44 }
 0x9d0   : > { %v1414_v46 = vpop.xlane.xlu1 %1413 }
 0x9d1   : > { %v1417_v47 = vadd.f32 1e-05, %v1415_v45  ;;  %v1416_v48 = vmul.f32 0.0078125, %v1414_v46 }
 0x9d3   : > { %2887 = vrsqrt.f32 %v1417_v47  ;;  %v1418_v49 = vadd.f32 1e-05, %v1416_v48 }
 0x9d5   : > { %2889 = vrsqrt.f32 %v1418_v49 }
 0x9dd   : > { %v2888_v51 = vpop.eup %2887 }
 0x9de   : > { %v1421_v53 = vmul.f32 %v2888_v51, %v3743_v14  ;;  %v2847_v14 = vld [vmem:[#allocation14 + $0x58] sm:$0xff]  }
 0x9df   : > { %v2890_v54 = vpop.eup %2889 }
 0x9e0   : > { %v1422_v55 = vmul.f32 %v2890_v54, %v3746_v16  ;;  %v1429_v0 = vmul.f32 %v2386_v52, %v1421_v53  ;;  %v2849_v16 = vld [vmem:[#allocation14 + $0x18] sm:$0xff]  }
 0x9e2   : > { %v1430_v57 = vmul.f32 %v2386_v52, %v1422_v55  ;;  %v1437_v58 = vadd.f32 %v2387_v56, %v1429_v0 }
 0x9e4   : > { %v1438_v59 = vadd.f32 %v2387_v56, %v1430_v57 }
 0x9e6   : > { %v1537_v61 = vpack.c.bf16 %v1438_v59, %v1437_v58 }
 0x9e8   : > { %1752 = vmatmul.mubr.bf16.vlgmr.msra.gmra.mrb[20].mxu1 %v1537_v61  ;;  %1795 = vmatmul.mubr.bf16.vlgmr.msra.gmra.mrb[12].mxu0 %v1537_v61 }
 0x9e9   : > { %2491 = vmatpush3.bf16.msra.mxu1 %v2837_v1  ;;  %2513 = vmatpush3.bf16.msra.mxu0 %v2838_v2 }
 0x9ea   : > { %2492 = vmatprep.subr.bf16.mxu1 %v2839_v3  ;;  %2514 = vmatprep.subr.bf16.mxu0 %v2840_v4 }
 0x9ed   : > { %2493 = vmatpush3.bf16.msra.mxu1 %v2841_v5  ;;  %2515 = vmatpush3.bf16.msra.mxu0 %v2842_v13 }
 0x9ee   : > { %2494 = vmatprep.subr.bf16.mxu1 %v2843_v9  ;;  %2516 = vmatprep.subr.bf16.mxu0 %v2844_v17 }
 0x9f1   : > { %2495 = vmatpush3.bf16.msra.mxu1 %v2845_v11  ;;  %2517 = vmatpush3.bf16.msra.mxu0 %v2846_v12 }
 0x9f2   : > { %2496 = vmatprep.subr.bf16.mxu1 %v2847_v14  ;;  %2518 = vmatprep.subr.bf16.mxu0 %v2848_v15 }
 0x9f5   : > { %2497 = vmatpush3.bf16.msra.mxu1 %v2849_v16  ;;  %2519 = vmatpush3.bf16.msra.mxu0 %v2850_v18 }
 0x9f6   : > { %2498 = vmatprep.subr.bf16.mxu1 %v2851_v19  ;;  %2520 = vmatprep.subr.bf16.mxu0 %v2852_v20 }
 0x9f9   : > { %2499 = vmatpush3.bf16.msra.mxu1 %v2853_v21  ;;  %2521 = vmatpush3.bf16.msra.mxu0 %v2854_v22 }
 0x9fa   : > { %2500 = vmatprep.subr.bf16.mxu1 %v2855_v23  ;;  %2522 = vmatprep.subr.bf16.mxu0 %v2856_v24 }
 0x9fd   : > { %2501 = vmatpush3.bf16.msra.mxu1 %v2857_v25  ;;  %2523 = vmatpush3.bf16.msra.mxu0 %v2858_v26 }
 0x9fe   : > { %2502 = vmatprep.subr.bf16.mxu1 %v2859_v27  ;;  %2524 = vmatprep.subr.bf16.mxu0 %v2860_v28 }
 0xa01   : > { %2503 = vmatpush3.bf16.msra.mxu1 %v2861_v29  ;;  %2525 = vmatpush3.bf16.msra.mxu0 %v2862_v30 }
 0xa02   : > { %2504 = vmatprep.subr.bf16.mxu1 %v2863_v31  ;;  %2526 = vmatprep.subr.bf16.mxu0 %v2864_v32 }
 0xa05   : > { %2505 = vmatpush3.bf16.msra.mxu1 %v2865_v33  ;;  %2527 = vmatpush3.bf16.msra.mxu0 %v2866_v34 }
 0xabb   : > { %v1753_v41 = vpop.f32.mrb[20].mxu1  ;;  %v1796_v42 = vpop.f32.mrb[12].mxu0 }
 0xabc   : > { %v3770_v43 = vadd.f32 %v1753_v41, %v1542_v37  ;;  %v3772_v44 = vadd.f32 %v1796_v42, %v1550_v38  ;;  %v1755_v45 = vpop.f32.mrb[21].mxu1  ;;  %v1798_v46 = vpop.f32.mrb[13].mxu0 }
 0xabd   : > { %v3774_v47 = vadd.f32 %v1755_v45, %v1546_v39  ;;  %v3776_v48 = vadd.f32 %v1798_v46, %v1554_v40  ;;  %v1757_v7 = vpop.f32.mrb[22].mxu1  ;;  %v1800_v49 = vpop.f32.mrb[14].mxu0 }
 0xabe   : > { %v1805_v8 = vmul.f32 %v3770_v43, %v3770_v43  ;;  %v1807_v6 = vmul.f32 %v3772_v44, %v3772_v44  ;;  %v3782_v10 = vadd.f32 %v1757_v7, %v1542_v37  ;;  %v3784_v51 = vadd.f32 %v1800_v49, %v1550_v38  ;;  %v1759_v52 = vpop.f32.mrb[23].mxu1  ;;  %v1802_v53 = vpop.f32.mrb[15].mxu0 }
 0xabf   : > { %v1806_v54 = vmul.f32 %v3774_v47, %v3774_v47  ;;  %v1808_v55 = vmul.f32 %v3776_v48, %v3776_v48  ;;  %v3790_v0 = vadd.f32 %v1759_v52, %v1546_v39  ;;  %v3792_v56 = vadd.f32 %v1802_v53, %v1554_v40 }
 0xac0   : > { %v1813_v57 = vmul.f32 %v1805_v8, %v3770_v43  ;;  %v1815_v58 = vmul.f32 %v1807_v6, %v3772_v44  ;;  %v1809_v59 = vmul.f32 %v3782_v10, %v3782_v10  ;;  %v1811_v61 = vmul.f32 %v3784_v51, %v3784_v51 }
 0xac1   : > { %v1814_v62 = vmul.f32 %v1806_v54, %v3774_v47  ;;  %v1816_v50 = vmul.f32 %v1808_v55, %v3776_v48  ;;  %v1810_v1 = vmul.f32 %v3790_v0, %v3790_v0  ;;  %v1812_v2 = vmul.f32 %v3792_v56, %v3792_v56 }
 0xac2   : > { %v1821_v3 = vmul.f32 0.044715, %v1813_v57  ;;  %v1823_v4 = vmul.f32 0.044715, %v1815_v58  ;;  %v1817_v5 = vmul.f32 %v1809_v59, %v3782_v10  ;;  %v1819_v13 = vmul.f32 %v1811_v61, %v3784_v51 }
 0xac3   : > { %v1822_v9 = vmul.f32 0.044715, %v1814_v62  ;;  %v1824_v17 = vmul.f32 0.044715, %v1816_v50  ;;  %v1818_v11 = vmul.f32 %v1810_v1, %v3790_v0  ;;  %v1820_v12 = vmul.f32 %v1812_v2, %v3792_v56 }
 0xac4   : > { %v1829_v14 = vadd.f32 %v1821_v3, %v3770_v43  ;;  %v1831_v15 = vadd.f32 %v1823_v4, %v3772_v44  ;;  %v1825_v16 = vmul.f32 0.044715, %v1817_v5  ;;  %v1827_v18 = vmul.f32 0.044715, %v1819_v13 }
 0xac5   : > { %v1830_v19 = vadd.f32 %v1822_v9, %v3774_v47  ;;  %v1832_v20 = vadd.f32 %v1824_v17, %v3776_v48  ;;  %v1826_v21 = vmul.f32 0.044715, %v1818_v11  ;;  %v1828_v22 = vmul.f32 0.044715, %v1820_v12 }
 0xac6   : > { %v1837_v23 = vmul.f32 0.7978846, %v1829_v14  ;;  %v1839_v24 = vmul.f32 0.7978846, %v1831_v15  ;;  %v1833_v25 = vadd.f32 %v1825_v16, %v3782_v10  ;;  %v1835_v26 = vadd.f32 %v1827_v18, %v3784_v51 }
 0xac7   : > { %v1838_v27 = vmul.f32 0.7978846, %v1830_v19  ;;  %v1840_v28 = vmul.f32 0.7978846, %v1832_v20  ;;  %v1834_v29 = vadd.f32 %v1826_v21, %v3790_v0  ;;  %v1836_v30 = vadd.f32 %v1828_v22, %v3792_v56 }
 0xac8   : > { %2891 = vtanh.f32 %v1837_v23  ;;  %v1841_v31 = vmul.f32 0.7978846, %v1833_v25  ;;  %v1843_v32 = vmul.f32 0.7978846, %v1835_v26 }
 0xac9   : > { %2893 = vtanh.f32 %v1839_v24  ;;  %v1842_v33 = vmul.f32 0.7978846, %v1834_v29  ;;  %v1844_v34 = vmul.f32 0.7978846, %v1836_v30 }
 0xaca   : > { %2895 = vtanh.f32 %v1838_v27 }
 0xacb   : > { %2897 = vtanh.f32 %v1840_v28 }
 0xacc   : > { %2899 = vtanh.f32 %v1841_v31 }
 0xacd   : > { %2901 = vtanh.f32 %v1843_v32 }
 0xace   : > { %2903 = vtanh.f32 %v1842_v33 }
 0xacf   : > { %2905 = vtanh.f32 %v1844_v34 }
 0xad2   : > { %v2892_v35 = vpop.eup %2891 }
 0xad3   : > { %v2894_v36 = vpop.eup %2893  ;;  %v1853_v37 = vadd.f32 1.0, %v2892_v35 }
 0xad4   : > { %v2896_v38 = vpop.eup %2895  ;;  %v1855_v39 = vadd.f32 1.0, %v2894_v36 }
 0xad5   : > { %v2898_v40 = vpop.eup %2897  ;;  %v1854_v41 = vadd.f32 1.0, %v2896_v38  ;;  %v1861_v7 = vmul.f32 0.5, %v1853_v37 }
 0xad6   : > { %v2900_v42 = vpop.eup %2899  ;;  %v1856_v45 = vadd.f32 1.0, %v2898_v40  ;;  %v1863_v6 = vmul.f32 0.5, %v1855_v39 }
 0xad7   : > { %v2902_v46 = vpop.eup %2901  ;;  %v1857_v49 = vadd.f32 1.0, %v2900_v42  ;;  %v1862_v57 = vmul.f32 0.5, %v1854_v41  ;;  %v1869_v62 = vmul.f32 %v1861_v7, %v3770_v43 }
 0xad8   : > { %v2904_v8 = vpop.eup %2903  ;;  %v1859_v52 = vadd.f32 1.0, %v2902_v46  ;;  %v1864_v61 = vmul.f32 0.5, %v1856_v45  ;;  %v1871_v2 = vmul.f32 %v1863_v6, %v3772_v44 }
 0xad9   : > { %v2906_v53 = vpop.eup %2905  ;;  %v1865_v54 = vmul.f32 0.5, %v1857_v49  ;;  %v1858_v55 = vadd.f32 1.0, %v2904_v8  ;;  %v1870_v5 = vmul.f32 %v1862_v57, %v3774_v47  ;;  %v2420_v47 = vld [vmem:[%s3947_s28] ss:$0 sm:$0xff] }
 0xada   : > { %v1867_v58 = vmul.f32 0.5, %v1859_v52  ;;  %v1860_v59 = vadd.f32 1.0, %v2906_v53  ;;  %v1872_v17 = vmul.f32 %v1864_v61, %v3776_v48 }
 0xadb   : > { %v1873_v50 = vmul.f32 %v1865_v54, %v3782_v10  ;;  %v1866_v1 = vmul.f32 0.5, %v1858_v55 }
 0xadc   : > { %v1875_v3 = vmul.f32 %v1867_v58, %v3784_v51  ;;  %v1868_v4 = vmul.f32 0.5, %v1860_v59 }
 0xadd   : > { %v1874_v13 = vmul.f32 %v1866_v1, %v3790_v0  ;;  %v1877_v9 = vpack.c.bf16 %v1873_v50, %v1869_v62 }
 0xade   : > { %v1876_v11 = vmul.f32 %v1868_v4, %v3792_v56  ;;  %v1879_v12 = vpack.c.bf16 %v1875_v3, %v1871_v2 }
 0xadf   : > { %v1878_v14 = vpack.c.bf16 %v1874_v13, %v1870_v5 }
 0xae0   : > { %v1880_v43 = vpack.c.bf16 %v1876_v11, %v1872_v17 }
 0xae1   : > { %2111 = vmatprep.mubr.bf16.mxu1 %v1878_v14 }
 0xae2   : > { %2152 = vmatprep.mubr.bf16.mxu0 %v1880_v43  ;;  %2112 = vmatmul.mubr.bf16.vlgmr.msra.gmra.mrb[24].mxu1 %v1877_v9 }
 0xae3   : > { %2153 = vmatmul.mubr.bf16.vlgmr.msra.gmra.mrb[16].mxu0 %v1879_v12 }
 0xbb5   : > { %v2506_v44 = vpop.f32.mrb[24].mxu1 }
 0xbb6   : > { %v2528_v10 = vpop.f32.mrb[16].mxu0  ;;  %v2507_v51 = vpop.f32.mrb[25].mxu1 }
 0xbb7   : > { %v2508_v0 = vadd.f32 %v2507_v51, %v2506_v44  ;;  %v2529_v48 = vpop.f32.mrb[17].mxu0  ;;  %v2509_v15 = vpop.f32.mrb[26].mxu1 }
 0xbb8   : > { %v2530_v56 = vadd.f32 %v2529_v48, %v2528_v10  ;;  %v2531_v16 = vpop.f32.mrb[18].mxu0  ;;  %v2510_v18 = vpop.f32.mrb[27].mxu1 }
 0xbb9   : > { %v2114_v19 = vadd.f32 %v2508_v0, %v2420_v47  ;;  %v2511_v20 = vadd.f32 %v2510_v18, %v2509_v15  ;;  %v2532_v21 = vpop.f32.mrb[19].mxu0 }
 0xbba   : > { %v2533_v22 = vadd.f32 %v2532_v21, %v2531_v16 }
 0xbbb   : > { %v2155_v23 = vadd.f32 %v2530_v56, %v2114_v19  ;;  %v2117_v24 = vadd.f32 %v2511_v20, %v2420_v47 }
 0xbbd   : > { %v2161_v25 = vadd.f32 %v2155_v23, %v3735_v60  ;;  %v2158_v26 = vadd.f32 %v2533_v22, %v2117_v24 }
 0xbbf   : > { %2163 = vst [vmem:[%s639_s15] sm:$0xff] %v2161_v25  ;;  %v2162_v27 = vadd.f32 %v2158_v26, %v3738_v63 }
 0xbc1   : > { %2164 = vst [vmem:[%s639_s15 + $0x8] sm:$0xff] %v2162_v27 }
 0xbc2   : > { %3146 = shalt.err (!%p3143_p9)
}
 0xbc3   : > { %s3147_s28 = scalar_lea.hbm %s3838_s7, 256  ;;  %s3151_s10 = scalar_lea.hbm %s3948_s17, 512 }
 0xbc4   : > { %p3148_p4 = scmp.ne.s32.totalorder %s3838_s7, %s3147_s28  ;;  %p3152_p5 = scmp.lt.u32.totalorder %s3838_s7, %s3948_s17 }
 0xbc5   : > { %p3153_p2 = scmp.lt.u32.totalorder %s3151_s10, %s3147_s28  ;;  %p3155_p10 = scmp.lt.u32.totalorder %s3147_s28, %s3838_s7 }
 0xbc6   : > { %p3149_p3 = pnand %p3148_p4, %p3949_p1 }
 0xbc7   : > { %p3154_p7 = por %p3153_p2, %p3152_p5 }
 0xbc8   : > { %p3150_p0 = pneg %p3149_p3 }
 0xbc9   : > { %p3156_p11 = por %p3155_p10, %p3154_p7 }
 0xbcb   : > { %p3157_p12 = pnand %p3156_p11, %p3150_p0 }
 0xbcd   : > { %3160 = shalt.err (!%p3157_p12)
}
 0xbce   : > { %s3238_s18 = smov 128   ;;  %s3239_s9 = smov 8  }
 0xbcf   : > { %2638 = dma.vmem_to_hbm [thread:$0]  (%p3949_p1), %s3833_s20, 256, %s3838_s7, %s2166_s1, %s3238_s18, %s3238_s18, %s3239_s9  }
 0xbd0 PF: > { %s2194_s0 = sand.u32 1, %s3203_s21   ;;  %p3950_p13 = scmp.ne.s32.totalorder %s3928_s26, 0 }
 0xbd1   : > { %p3951_p8 = scmp.ge.s32.totalorder %s3215_s24, 2  ;;  %s2195_s28 = scalar_lea.sflag [#allocation4], %s2194_s0 }
 0xbd3   : > { %p2667_p6 = pnand %p3951_p8, %p3950_p13 }
 0xbd5   : > { %3198 = dma.done.wait (!%p2667_p6), %s2195_s28, 256  }
 0xbd6   : > { %3200 = vsyncadd (!%p2667_p6), %s2195_s28, 4294967040  ;;  %p33_p9 = scmp.ge.s32.totalorder %s3527_s29, 4   ;;  %s3952_s21 = smov %s3207_s22 }
 0xbd7   : > { %s3953_s22 = smov %s3211_s23  ;;  %s3954_s23 = smov %s3539_s25 }
 0xbd8   : > { %s3955_s24 = smov %s3527_s29  ;;  %35 = sbr.rel (!%p33_p9) target bundleno = 19 (0x13), region = 157 }
 0xbdf   :  { %2200 = vsyncpa [#allocation3], 1 }
 0xbe0   :  { %2202 = vsyncpa [#allocation3 + $0x1], 1 }
 0xbe1   :  { %2203 = vsyncpa [#allocation6], 1 }
 0xbe2   :  { %2204 = vsyncpa [#allocation9], 1 }
 0xbe3   :  { %2205 = vsyncpa [#allocation12], 1 }
 0xbe4   :  { %2206 = vsyncpa [#allocation15], 1 }
 0xbe5   :  { %2207 = vsyncpa [#allocation4], 1 }
 0xbe6   :  { %2209 = vsyncpa [#allocation4 + $0x1], 1 }

</bundles_post_ra>
